<compile_context>
chip_gen: v5e
topology: v5e:2x2
jax: 0.10.0
libtpu: 0.0.40
codegen_flags: <defaults>
</compile_context>

<pallas_src>
import jax
import jax.numpy as jnp
from jax.experimental import pallas as pl
from jax.experimental.pallas import tpu as pltpu


def _round_up(n, m):
    return ((n + m - 1) // m) * m


# --------------------------------------------------------------------------- #
# Kernel: one batch tile through encoder + decoder, fully fused.
# --------------------------------------------------------------------------- #
def _ae_kernel(x_ref, w1_ref, b1_ref, w2_ref, b2_ref, out_ref):
    # Encoder: h = relu(x @ W1 + b1)   (f32 accumulation on the MXU)
    x = x_ref[...]
    h = jnp.dot(x, w1_ref[...], preferred_element_type=jnp.float32)
    h = jnp.maximum(h + b1_ref[...], 0.0)          # b1 is (1, E) -> broadcasts

    # Decoder: y = relu(h @ W2 + b2)
    y = jnp.dot(h.astype(w2_ref.dtype), w2_ref[...],
                preferred_element_type=jnp.float32)
    y = jnp.maximum(y + b2_ref[...], 0.0)          # b2 is (1, D)

    out_ref[...] = y.astype(out_ref.dtype)


# --------------------------------------------------------------------------- #
# One-time parameter padding (hoisted out of the per-call forward).
# Zero-padding is exact: relu(0 + 0) = 0 and zero rows/cols of W contribute
# nothing; padded output columns are sliced away in the wrapper.
# --------------------------------------------------------------------------- #
def pad_params(w1, b1, w2, b2):
    """w1:[D,E] b1:[1,E] w2:[E,D] b2:[1,D]  ->  lane-dense (multiples of 128)."""
    input_dim, enc_dim = w1.shape
    d_pad = _round_up(input_dim, 128)
    e_pad = _round_up(enc_dim, 128)
    if (d_pad, e_pad) != (input_dim, enc_dim):
        w1 = jnp.pad(w1, ((0, d_pad - input_dim), (0, e_pad - enc_dim)))
        b1 = jnp.pad(b1, ((0, 0), (0, e_pad - enc_dim)))
        w2 = jnp.pad(w2, ((0, e_pad - enc_dim), (0, d_pad - input_dim)))
        b2 = jnp.pad(b2, ((0, 0), (0, d_pad - input_dim)))
    return w1, b1, w2, b2


def _vmem_capacity_bytes():
    try:
        return int(pltpu.get_tpu_info().vmem_capacity_bytes)
    except Exception:
        return 64 << 20      # conservative default: v7x per-TensorCore VMEM


# --------------------------------------------------------------------------- #
# Forward pass wrapper.
# --------------------------------------------------------------------------- #
def autoencoder_forward(x, w1, b1, w2, b2, *, tm_max=2048,
                        single_buffer_weights=True):
    """x: [B, input_dim]; weights ideally pre-padded via pad_params().

    Returns [B, input_dim] = relu(relu(x @ W1 + b1) @ W2 + b2).
    """
    B, input_dim = x.shape

    # Fallback: pad weights here if the caller didn't (prefer pad_params once).
    if (w1.shape[0] % 128) or (w1.shape[1] % 128):
        w1, b1, w2, b2 = pad_params(w1, b1, w2, b2)
    d_pad, e_pad = w1.shape
    assert d_pad % 128 == 0 and e_pad % 128 == 0
    assert input_dim <= d_pad
    assert b1.shape == (1, e_pad)
    assert w2.shape == (e_pad, d_pad)
    assert b2.shape == (1, d_pad)

    # x feature padding (per-call, only when input_dim isn't 128-aligned).
    # Required because the feature dim is a contraction dim; batch padding is
    # NOT needed (rows are independent -> ragged last block is masked).
    if input_dim != d_pad:
        x = jnp.pad(x, ((0, 0), (0, d_pad - input_dim)))

    # ---- Tile-size selection ------------------------------------------------
    isz = x.dtype.itemsize
    wsz = w1.dtype.itemsize
    w_bufs = 1 if single_buffer_weights else 2

    cap = int(0.8 * _vmem_capacity_bytes())          # leave compiler headroom
    weight_bytes = w_bufs * (2 * d_pad * e_pad + e_pad + d_pad) * wsz
    # Per-row VMEM: x + out tiles double-buffered, plus f32 h / y intermediates.
    per_row = 2 * 2 * d_pad * isz + 4 * (e_pad + d_pad)
    tm_vmem = max(8, ((cap - weight_bytes) // max(per_row, 1)) // 8 * 8)

    tm_cap = max(8, min(tm_max, tm_vmem, _round_up(B, 8)) // 8 * 8)

    n_steps = pl.cdiv(B, tm_cap)
    if B > 8:
        n_steps = max(n_steps, 2)      # >=2 steps: DMA/compute overlap + 2 TCs busy
    if n_steps > 1 and n_steps % 2:
        n_steps += 1                   # even split across v7x's TensorCores
    tm = min(tm_cap, _round_up(pl.cdiv(B, n_steps), 8))
    grid = (pl.cdiv(B, tm),)

    est = (2 * 2 * tm * d_pad * isz    # x + out tiles (double-buffered)
           + weight_bytes              # resident weights/biases
           + 4 * tm * (e_pad + d_pad)) # f32 intermediates
    vmem_limit = int(min(max(2 * est, 16 << 20), cap))

    # ---- pallas_call --------------------------------------------------------
    def run(weight_mode):
        w_kw = {} if weight_mode is None else {"pipeline_mode": weight_mode}
        grid_spec = pl.GridSpec(
            grid=grid,
            in_specs=[
                pl.BlockSpec((tm, d_pad), lambda i: (i, 0)),             # x tile
                pl.BlockSpec((d_pad, e_pad), lambda i: (0, 0), **w_kw),  # W1 (resident)
                pl.BlockSpec((1, e_pad), lambda i: (0, 0), **w_kw),      # b1
                pl.BlockSpec((e_pad, d_pad), lambda i: (0, 0), **w_kw),  # W2 (resident)
                pl.BlockSpec((1, d_pad), lambda i: (0, 0), **w_kw),      # b2
            ],
            out_specs=pl.BlockSpec((tm, d_pad), lambda i: (i, 0)),
        )
        return pl.pallas_call(
            _ae_kernel,
            out_shape=jax.ShapeDtypeStruct((B, d_pad), x.dtype),
            grid_spec=grid_spec,
            compiler_params=pltpu.CompilerParams(
                dimension_semantics=("parallel",),   # shard batch grid across TCs
                vmem_limit_bytes=vmem_limit,
            ),
        )(x, w1, b1, w2, b2)

    if single_buffer_weights:
        try:
            out = run(pl.Buffered(buffer_count=1))   # weights DMA'd once, 1 buffer
        except Exception:
            out = run(None)                          # fallback: default pipelining
    else:
        out = run(None)

    return out[:, :input_dim] if d_pad != input_dim else out


# --------------------------------------------------------------------------- #
# PyTorch-style init (U(-1/sqrt(fan_in), 1/sqrt(fan_in))), weights transposed.
# --------------------------------------------------------------------------- #
def init_params(key, input_dim, encoding_dim, dtype=jnp.float32):
    k1, k2, k3, k4 = jax.random.split(key, 4)
    bound1 = 1.0 / (input_dim ** 0.5)
    bound2 = 1.0 / (encoding_dim ** 0.5)
    w1 = jax.random.uniform(k1, (input_dim, encoding_dim), dtype,
                            minval=-bound1, maxval=bound1)
    b1 = jax.random.uniform(k2, (1, encoding_dim), dtype,
                            minval=-bound1, maxval=bound1)
    w2 = jax.random.uniform(k3, (encoding_dim, input_dim), dtype,
                            minval=-bound2, maxval=bound2)
    b2 = jax.random.uniform(k4, (1, input_dim), dtype,
                            minval=-bound2, maxval=bound2)
    return w1, b1, w2, b2


if __name__ == "__main__":
    key = jax.random.PRNGKey(0)
    # Deliberately awkward small shapes:
    #   batch=500      -> ragged last batch block (no wrapper-side batch pad)
    #   input_dim=96   -> feature dim padded 96 -> 128 (x per-call, weights once)
    #   encoding_dim=32-> padded to 128 (lane-dense intermediate)
    batch, input_dim, encoding_dim = 500, 96, 32

    kx, kp = jax.random.split(key)
    x = jax.random.normal(kx, (batch, input_dim), jnp.float32)
    w1, b1, w2, b2 = init_params(kp, input_dim, encoding_dim)

    # Pad static parameters ONCE (hoisted out of the forward pass).
    w1p, b1p, w2p, b2p = pad_params(w1, b1, w2, b2)

    out = autoencoder_forward(x, w1p, b1p, w2p, b2p)
    out = jax.block_until_ready(out)

    # Pure-JAX reference of the same forward pass (Linear->ReLU->Linear->ReLU).
    h_ref = jnp.maximum(x @ w1 + b1, 0.0)
    y_ref = jnp.maximum(h_ref @ w2 + b2, 0.0)
    assert out.shape == (batch, input_dim)
    assert jnp.allclose(out, y_ref, atol=1e-4, rtol=1e-4), \
        float(jnp.max(jnp.abs(out - y_ref)))

    print("KERNEL_OK")
</pallas_src>

<mosaic_0001>
module attributes {stable_mosaic.version = 11 : i64} {
  func.func @_ae_kernel(%arg0: i32, %arg1: memref<256x128xf32, #tpu.memory_space<vmem>>, %arg2: memref<128x128xf32, #tpu.memory_space<vmem>>, %arg3: memref<1x128xf32, #tpu.memory_space<vmem>>, %arg4: memref<128x128xf32, #tpu.memory_space<vmem>>, %arg5: memref<1x128xf32, #tpu.memory_space<vmem>>, %arg6: memref<256x128xf32, #tpu.memory_space<vmem>>) attributes {dimension_semantics = [#tpu.dimension_semantics<parallel>], iteration_bounds = array<i64: 2>, scalar_prefetch = 0 : i64, scratch_operands = 0 : i64, tpu.core_type = #tpu.core_type<tc>, window_params = [{transform_indices = @transform_0, window_bounds = array<i64: 256, 128>}, {pipeline_mode = #tpu.pipeline_mode<synchronous>, transform_indices = @transform_1, window_bounds = array<i64: 128, 128>}, {pipeline_mode = #tpu.pipeline_mode<synchronous>, transform_indices = @transform_2, window_bounds = array<i64: 1, 128>}, {pipeline_mode = #tpu.pipeline_mode<synchronous>, transform_indices = @transform_3, window_bounds = array<i64: 128, 128>}, {pipeline_mode = #tpu.pipeline_mode<synchronous>, transform_indices = @transform_4, window_bounds = array<i64: 1, 128>}, {transform_indices = @transform_5, window_bounds = array<i64: 256, 128>}]} {
    %c0 = arith.constant 0 : index
    %c0_0 = arith.constant 0 : index
    %0 = vector.load %arg1[%c0, %c0_0] : memref<256x128xf32, #tpu.memory_space<vmem>>, vector<256x128xf32>
    %c0_1 = arith.constant 0 : index
    %c0_2 = arith.constant 0 : index
    %1 = vector.load %arg2[%c0_1, %c0_2] : memref<128x128xf32, #tpu.memory_space<vmem>>, vector<128x128xf32>
    %cst = arith.constant dense<0.000000e+00> : vector<256x128xf32>
    %2 = tpu.matmul %0, %1, %cst {dimension_numbers = #tpu.dot_dimension_numbers<[1], [0], [0], [1], [0, 0, 1, 1], [], []>} : vector<256x128xf32>, vector<128x128xf32>, vector<256x128xf32> -> vector<256x128xf32>
    %c0_3 = arith.constant 0 : index
    %c0_4 = arith.constant 0 : index
    %3 = vector.load %arg3[%c0_3, %c0_4] : memref<1x128xf32, #tpu.memory_space<vmem>>, vector<1x128xf32>
    %4 = vector.broadcast %3 : vector<1x128xf32> to vector<256x128xf32>
    %5 = arith.addf %2, %4 : vector<256x128xf32>
    %cst_5 = arith.constant 0.000000e+00 : f32
    %6 = vector.broadcast %cst_5 : f32 to vector<256x128xf32>
    %7 = arith.maximumf %5, %6 : vector<256x128xf32>
    %c0_6 = arith.constant 0 : index
    %c0_7 = arith.constant 0 : index
    %8 = vector.load %arg4[%c0_6, %c0_7] : memref<128x128xf32, #tpu.memory_space<vmem>>, vector<128x128xf32>
    %cst_8 = arith.constant dense<0.000000e+00> : vector<256x128xf32>
    %9 = tpu.matmul %7, %8, %cst_8 {dimension_numbers = #tpu.dot_dimension_numbers<[1], [0], [0], [1], [0, 0, 1, 1], [], []>} : vector<256x128xf32>, vector<128x128xf32>, vector<256x128xf32> -> vector<256x128xf32>
    %c0_9 = arith.constant 0 : index
    %c0_10 = arith.constant 0 : index
    %10 = vector.load %arg5[%c0_9, %c0_10] : memref<1x128xf32, #tpu.memory_space<vmem>>, vector<1x128xf32>
    %11 = vector.broadcast %10 : vector<1x128xf32> to vector<256x128xf32>
    %12 = arith.addf %9, %11 : vector<256x128xf32>
    %cst_11 = arith.constant 0.000000e+00 : f32
    %13 = vector.broadcast %cst_11 : f32 to vector<256x128xf32>
    %14 = arith.maximumf %12, %13 : vector<256x128xf32>
    %c0_12 = arith.constant 0 : index
    %c0_13 = arith.constant 0 : index
    %15 = vector.load %arg6[%c0_12, %c0_13] : memref<256x128xf32, #tpu.memory_space<vmem>>, vector<256x128xf32>
    tpu.vector_store %arg6[%c0_12, %c0_13], %14 {strides = array<i32>} : memref<256x128xf32, #tpu.memory_space<vmem>>, vector<256x128xf32>,
    return
  }
  func.func @transform_0(%arg0: i32) -> (i32, i32) {
    %c0_i32 = arith.constant 0 : i32
    %c0_i32_0 = arith.constant 0 : i32
    return %arg0, %c0_i32 : i32, i32
  }
  func.func @transform_1(%arg0: i32) -> (i32, i32) {
    %c0_i32 = arith.constant 0 : i32
    %c0_i32_0 = arith.constant 0 : i32
    %c0_i32_1 = arith.constant 0 : i32
    return %c0_i32, %c0_i32_0 : i32, i32
  }
  func.func @transform_2(%arg0: i32) -> (i32, i32) {
    %c0_i32 = arith.constant 0 : i32
    %c0_i32_0 = arith.constant 0 : i32
    %c0_i32_1 = arith.constant 0 : i32
    return %c0_i32, %c0_i32_0 : i32, i32
  }
  func.func @transform_3(%arg0: i32) -> (i32, i32) {
    %c0_i32 = arith.constant 0 : i32
    %c0_i32_0 = arith.constant 0 : i32
    %c0_i32_1 = arith.constant 0 : i32
    return %c0_i32, %c0_i32_0 : i32, i32
  }
  func.func @transform_4(%arg0: i32) -> (i32, i32) {
    %c0_i32 = arith.constant 0 : i32
    %c0_i32_0 = arith.constant 0 : i32
    %c0_i32_1 = arith.constant 0 : i32
    return %c0_i32, %c0_i32_0 : i32, i32
  }
  func.func @transform_5(%arg0: i32) -> (i32, i32) {
    %c0_i32 = arith.constant 0 : i32
    %c0_i32_0 = arith.constant 0 : i32
    return %arg0, %c0_i32 : i32, i32
  }
}

module attributes {stable_mosaic.version = 11 : i64} {
  func.func @_ae_kernel(%arg0: i32, %arg1: memref<256x128xf32, #tpu.memory_space<vmem>>, %arg2: memref<128x128xf32, #tpu.memory_space<vmem>>, %arg3: memref<1x128xf32, #tpu.memory_space<vmem>>, %arg4: memref<128x128xf32, #tpu.memory_space<vmem>>, %arg5: memref<1x128xf32, #tpu.memory_space<vmem>>, %arg6: memref<256x128xf32, #tpu.memory_space<vmem>>) attributes {dimension_semantics = [#tpu.dimension_semantics<parallel>], iteration_bounds = array<i64: 2>, scalar_prefetch = 0 : i64, scratch_operands = 0 : i64, tpu.core_type = #tpu.core_type<tc>, window_params = [{transform_indices = @transform_0, window_bounds = array<i64: 256, 128>}, {pipeline_mode = #tpu.pipeline_mode<synchronous>, transform_indices = @transform_1, window_bounds = array<i64: 128, 128>}, {pipeline_mode = #tpu.pipeline_mode<synchronous>, transform_indices = @transform_2, window_bounds = array<i64: 1, 128>}, {pipeline_mode = #tpu.pipeline_mode<synchronous>, transform_indices = @transform_3, window_bounds = array<i64: 128, 128>}, {pipeline_mode = #tpu.pipeline_mode<synchronous>, transform_indices = @transform_4, window_bounds = array<i64: 1, 128>}, {transform_indices = @transform_5, window_bounds = array<i64: 256, 128>}]} {
    %c0 = arith.constant 0 : index
    %c0_0 = arith.constant 0 : index
    %0 = vector.load %arg1[%c0, %c0_0] : memref<256x128xf32, #tpu.memory_space<vmem>>, vector<256x128xf32>
    %c0_1 = arith.constant 0 : index
    %c0_2 = arith.constant 0 : index
    %1 = vector.load %arg2[%c0_1, %c0_2] : memref<128x128xf32, #tpu.memory_space<vmem>>, vector<128x128xf32>
    %cst = arith.constant dense<0.000000e+00> : vector<256x128xf32>
    %2 = tpu.matmul %0, %1, %cst {dimension_numbers = #tpu.dot_dimension_numbers<[1], [0], [0], [1], [0, 0, 1, 1], [], []>} : vector<256x128xf32>, vector<128x128xf32>, vector<256x128xf32> -> vector<256x128xf32>
    %c0_3 = arith.constant 0 : index
    %c0_4 = arith.constant 0 : index
    %3 = vector.load %arg3[%c0_3, %c0_4] : memref<1x128xf32, #tpu.memory_space<vmem>>, vector<1x128xf32>
    %4 = vector.broadcast %3 : vector<1x128xf32> to vector<256x128xf32>
    %5 = arith.addf %2, %4 : vector<256x128xf32>
    %cst_5 = arith.constant 0.000000e+00 : f32
    %6 = vector.broadcast %cst_5 : f32 to vector<256x128xf32>
    %7 = arith.maximumf %5, %6 : vector<256x128xf32>
    %c0_6 = arith.constant 0 : index
    %c0_7 = arith.constant 0 : index
    %8 = vector.load %arg4[%c0_6, %c0_7] : memref<128x128xf32, #tpu.memory_space<vmem>>, vector<128x128xf32>
    %cst_8 = arith.constant dense<0.000000e+00> : vector<256x128xf32>
    %9 = tpu.matmul %7, %8, %cst_8 {dimension_numbers = #tpu.dot_dimension_numbers<[1], [0], [0], [1], [0, 0, 1, 1], [], []>} : vector<256x128xf32>, vector<128x128xf32>, vector<256x128xf32> -> vector<256x128xf32>
    %c0_9 = arith.constant 0 : index
    %c0_10 = arith.constant 0 : index
    %10 = vector.load %arg5[%c0_9, %c0_10] : memref<1x128xf32, #tpu.memory_space<vmem>>, vector<1x128xf32>
    %11 = vector.broadcast %10 : vector<1x128xf32> to vector<256x128xf32>
    %12 = arith.addf %9, %11 : vector<256x128xf32>
    %cst_11 = arith.constant 0.000000e+00 : f32
    %13 = vector.broadcast %cst_11 : f32 to vector<256x128xf32>
    %14 = arith.maximumf %12, %13 : vector<256x128xf32>
    %c0_12 = arith.constant 0 : index
    %c0_13 = arith.constant 0 : index
    %15 = vector.load %arg6[%c0_12, %c0_13] : memref<256x128xf32, #tpu.memory_space<vmem>>, vector<256x128xf32>
    tpu.vector_store %arg6[%c0_12, %c0_13], %14 {strides = array<i32>} : memref<256x128xf32, #tpu.memory_space<vmem>>, vector<256x128xf32>,
    return
  }
  func.func @transform_0(%arg0: i32) -> (i32, i32) {
    %c0_i32 = arith.constant 0 : i32
    %c0_i32_0 = arith.constant 0 : i32
    return %arg0, %c0_i32 : i32, i32
  }
  func.func @transform_1(%arg0: i32) -> (i32, i32) {
    %c0_i32 = arith.constant 0 : i32
    %c0_i32_0 = arith.constant 0 : i32
    %c0_i32_1 = arith.constant 0 : i32
    return %c0_i32, %c0_i32_0 : i32, i32
  }
  func.func @transform_2(%arg0: i32) -> (i32, i32) {
    %c0_i32 = arith.constant 0 : i32
    %c0_i32_0 = arith.constant 0 : i32
    %c0_i32_1 = arith.constant 0 : i32
    return %c0_i32, %c0_i32_0 : i32, i32
  }
  func.func @transform_3(%arg0: i32) -> (i32, i32) {
    %c0_i32 = arith.constant 0 : i32
    %c0_i32_0 = arith.constant 0 : i32
    %c0_i32_1 = arith.constant 0 : i32
    return %c0_i32, %c0_i32_0 : i32, i32
  }
  func.func @transform_4(%arg0: i32) -> (i32, i32) {
    %c0_i32 = arith.constant 0 : i32
    %c0_i32_0 = arith.constant 0 : i32
    %c0_i32_1 = arith.constant 0 : i32
    return %c0_i32, %c0_i32_0 : i32, i32
  }
  func.func @transform_5(%arg0: i32) -> (i32, i32) {
    %c0_i32 = arith.constant 0 : i32
    %c0_i32_0 = arith.constant 0 : i32
    return %arg0, %c0_i32 : i32, i32
  }
}

</mosaic_0001>

<bundles_post_ra>
// kernel: tpu_custom_call.1
= control target key start
LH: loop header
LB: loop body
LE: loop exit
PB: predicated region body
PF: predicated region fallthrough
CT: control target
= control target key end

     0   :  { %s1502_s0 = inlined_call_operand.hbm [shape: f32[500,128], index: 0, kind: input, shape index: {}]   ;;  %s1503_s1 = inlined_call_operand.hbm [shape: f32[128,128], index: 1, kind: input, shape index: {}]   ;;  %s1504_s2 = inlined_call_operand.vmem [shape: f32[1,128], index: 2, kind: input, shape index: {}]   ;;  %s1505_s3 = inlined_call_operand.hbm [shape: f32[128,128], index: 3, kind: input, shape index: {}]   ;;  %s1506_s4 = inlined_call_operand.vmem [shape: f32[1,128], index: 4, kind: input, shape index: {}]   ;;  %s1507_s5 = inlined_call_operand.hbm [shape: f32[500,128], index: 5, kind: output, shape index: {}]  }
   0x1   :  { %1511 = sst [smem:[#allocation12_spill]] %s1503_s1 }
   0x2   :  { %10 = vsyncpa [#allocation3], 0 }
   0x3   :  { %12 = vsyncpa [#allocation3 + $0x1], 0 }
   0x4   :  { %13 = vsyncpa [#allocation6], 0 }
   0x5   :  { %14 = vsyncpa [#allocation4], 0 }
   0x6   :  { %16 = vsyncpa [#allocation4 + $0x1], 0  ;;  %s1154_s18 = smov 0   ;;  %s1156_s19 = smov 0  }
   0x7   :  { %s1158_s20 = smov 0   ;;  %s1160_s21 = smov 0  }
   0x8 LB: > { %s1175_s22 = sadd.s32 4294967295, %s1112_s21   ;;  %s804_s23 = sadd.s32 4294967294, %s1112_s21   ;;  %s1112_s21 = sphi %s1160_s21, %s1528_s21   ;;  %s1108_s20 = sphi %s1158_s20, %s1527_s20   ;;  %s1104_s19 = sphi %s1156_s19, %s1526_s19   ;;  %s1100_s18 = sphi %s1154_s18, %s1525_s18  }
   0x9   : > { %s1179_s24 = sadd.s32 1, %s1112_s21   ;;  %s29_s25 = sadd.s32 1, %s1108_s20 }
   0xa   : > { %s26_s26 = ssub.s32 %s1112_s21, %s1179_s24  ;;  %p36_p0 = scmp.ne.s32.totalorder %s1108_s20, %s1104_s19 }
   0xb   : > { %p27_p1 = scmp.eq.s32.totalorder %s26_s26, 0  ;;  %p37_p2 = scmp.eq.s32.totalorder %s1112_s21, 0 }
   0xc   : > { %p42_p3 = scmp.ne.s32.totalorder %s1104_s19, %s1100_s18  ;;  %p1510_p4 = scmp.eq.s32.totalorder %s1175_s22, 0 }
   0xd   : > { %s1191_s27 = scalar_select %p27_p1, %s1108_s20, %s29_s25  }
   0xe   : > { %p1193_p5 = por %p37_p2, %p36_p0  ;;  %p1199_p6 = por %p1510_p4, %p42_p3 }
   0xf   : > { %p150_p7 = scmp.eq.s32.totalorder %s1175_s22, 1  ;;  %p156_p8 = scmp.eq.s32.totalorder %s804_s23, 1 }
  0x10   : > { %p805_p9 = scmp.ge.s32.totalorder %s1112_s21, 1  ;;  %p163_p10 = scmp.lt.s32.totalorder %s1112_s21, 3 }
  0x11   : > { %p1206_p11 = por %p150_p7, %p36_p0  ;;  %p1210_p12 = por %p156_p8, %p42_p3 }
  0x12   : > { %p1214_p13 = pnand %p805_p9, %p163_p10  ;;  %s1517_s1 = sld [smem:[#allocation12_spill]] }
  0x13   : > { %s1515_s6 = scalar_select %p1210_p12, 1, 0 }
  0x14   : > { %p874_p1 = pneg %p1214_p13  ;;  %s1114_s11 = smov [#allocation5]  }
  0x15   : > { %s176_s12 = sshll.u32 %s1114_s11, 4  ;;  %s191_s15 = sshll.u32 %s1505_s3, 4  ;;  %s177_s12 = int_to_ptr.vmem [resolvable:$true] %s176_s12  ;;  %s192_s15 = int_to_ptr.hbm [resolvable:$true] %s191_s15 }
  0x16   : > { %p875_p0 = pnand %p874_p1, %p1510_p4  ;;  %s1115_s16 = smov 128  }
  0x17   : > { %s1116_s17 = smov 8   ;;  %s1117_s23 = smov [#allocation7]  }
  0x18   : > { %s174_s10 = sshll.u32 %s1517_s1, 4  ;;  %s193_s25 = sshll.u32 %s1117_s23, 4  ;;  %s175_s10 = int_to_ptr.hbm [resolvable:$true] %s174_s10  ;;  %s194_s25 = int_to_ptr.vmem [resolvable:$true] %s193_s25 }
  0x19   : > { %877 = dma.hbm_to_vmem [thread:$0]  (!%p875_p0), %s175_s10, 2048, %s177_s12, [#allocation6], %s1115_s16, %s1115_s16, %s1116_s17  }
  0x1a   : > { %880 = dma.hbm_to_vmem [thread:$0]  (!%p875_p0), %s192_s15, 2048, %s194_s25, [#allocation6], %s1115_s16, %s1115_s16, %s1116_s17  }
  0x1b   : > { %p1509_p2 = scmp.ge.s32.totalorder %s1112_s21, 2 }
  0x1d   : > { %206 = sbr.rel (%p1509_p2) target bundleno = 71 (0x47), region = 32 }
  0x22   : > { %209 = sbr.rel (!%p1193_p5) target bundleno = 71 (0x47), region = 36  ;;  %s210_s26 = sand.u32 (%p1193_p5), 1, %s1108_s20  }
  0x23   : > { %s810_s8 = sshll.u32 (%p1193_p5), %s1112_s21, 5  ;;  %s809_s9 = sshll.u32 (%p1193_p5), %s210_s26, 8 }
  0x24   : > { %s216_s11 = ssub.s32 (%p1193_p5), 63, %s810_s8  ;;  %s1238_s14 = scalar_lea.sflag (%p1193_p5), [#allocation3], %s210_s26 }
  0x25   : > { %p217_p3 = scmp.lt.s32.totalorder (%p1193_p5), %s216_s11, 32  ;;  %s214_s15 = scalar_lea.vmem (%p1193_p5), [#allocation2], %s809_s9 }
  0x27   : > { %s1530_s11 = smov (!%p217_p3, %s216_s11), 32 }
  0x28   : > { %s811_s10 = sshll.u32 %s1530_s11, 3 }
  0x29   : > { %s220_s12 = ssub.s32 256, %s811_s10 }
  0x2a   : > { %s221_s13 = sshll.u32 %s220_s12, 4 }
  0x2b   : > { %222 = vsyncadd %s1238_s14, %s221_s13  ;;  %p1241_p5 = scmp.ne.s32.totalorder %s811_s10, 0  ;;  %s830_s16 = sshll.u32 %s1112_s21, 8 }
  0x2c   : > { %s225_s25 = scalar_lea.hbm %s1502_s0, %s830_s16  ;;  %s1249_s8 = sshll.u32 %s214_s15, 4  ;;  %s230_s8 = int_to_ptr.vmem [resolvable:$true] %s1249_s8 }
  0x2d   : > { %s227_s26 = sshll.u32 %s225_s25, 4  ;;  %s1508_s9 = sshll.u32 %s1530_s11, 7  ;;  %s1252_s26 = int_to_ptr.hbm [resolvable:$true] %s227_s26 }
  0x2e   : > { %s992_s12 = sshra.s32 %s1252_s26, 4  ;;  %s994_s10 = sshrl.u32 %s1508_s9, 4  ;;  %s993_s12 = int_to_ptr.hbm [resolvable:$true] %s992_s12 }
  0x2f   : > { %s999_s13 = scalar_lea.hbm %s993_s12, %s994_s10  ;;  %s1003_s15 = scalar_lea.hbm %s1502_s0, 504 }
  0x30   : > { %p1000_p7 = scmp.ne.s32.totalorder %s993_s12, %s999_s13  ;;  %p1004_p10 = scmp.lt.s32.totalorder %s993_s12, %s1502_s0 }
  0x31   : > { %p1005_p1 = scmp.lt.s32.totalorder %s1003_s15, %s999_s13 }
  0x32   : > { %p1001_p8 = pnand %p1000_p7, %p1241_p5 }
  0x33   : > { %p1006_p0 = por %p1005_p1, %p1004_p10 }
  0x34   : > { %p1002_p9 = pneg %p1001_p8 }
  0x36   : > { %p1007_p3 = pnand %p1006_p0, %p1002_p9 }
  0x38   : > { %1010 = shalt.err (!%p1007_p3)
}
  0x39   : > { %s1011_s9 = sshra.s32 %s230_s8, 4  ;;  %s1118_s17 = smov [#allocation2]   ;;  %s1012_s9 = int_to_ptr.vmem [resolvable:$true] %s1011_s9 }
  0x3a   : > { %s1018_s1 = scalar_lea.vmem %s1012_s9, %s994_s10  ;;  %s1022_s16 = scalar_lea.vmem %s1118_s17, 512 }
  0x3b   : > { %p1019_p7 = scmp.ne.s32.totalorder %s1012_s9, %s1018_s1  ;;  %p1024_p4 = scmp.lt.s32.totalorder %s1022_s16, %s1018_s1 }
  0x3d   : > { %p1020_p8 = pnand %p1019_p7, %p1241_p5 }
  0x3f   : > { %p1021_p2 = pneg %p1020_p8 }
  0x41   : > { %p1026_p12 = pnand %p1024_p4, %p1021_p2 }
  0x43   : > { %1029 = shalt.err (!%p1026_p12)
}
  0x44   : > { %s1119_s12 = smov 128   ;;  %s1120_s13 = smov 8  }
  0x45   : > { %s1519_s15 = sshll.u32 %s1530_s11, 7 }
  0x46   : > { %235 = dma.hbm_to_vmem [thread:$0]  (%p1241_p5), %s1252_s26, %s1519_s15, %s230_s8, %s1238_s14, %s1119_s12, %s1119_s12, %s1120_s13  }
  0x47 PF: > { %241 = sbr.rel (%p1214_p13) target bundleno = 536 (0x218), region = 40  ;;  %s1281_s1 = sand.u32 (!%p1214_p13), 1, %s1104_s19  }
  0x48   : > { %s817_s9 = sshll.u32 (!%p1214_p13), %s1281_s1, 8  ;;  %s244_s10 = scalar_lea.sflag (!%p1214_p13), [#allocation3], %s1281_s1 }
  0x49   : > { %s1287_s23 = scalar_lea.vmem (!%p1214_p13), [#allocation2], %s817_s9 }
  0x4c   : > { %1087 = dma.done.wait (%p1199_p6), %s244_s10, 4096  }
  0x4d   : > { %1089 = vsyncadd (%p1199_p6), %s244_s10, 4294963200  ;;  %p1520_p4 = scmp.eq.s32.totalorder %s1175_s22, 0 }
  0x4f   : > { %1091 = dma.done.wait (%p1520_p4), [#allocation6], 4096   ;;  %p1521_p12 = pmov %p1520_p4 }
  0x50   : > { %v342_v0 = vld [vmem:[#allocation5 + $0x78] sm:$0xff]  ;;  %v341_v1 = vld [vmem:[#allocation5 + $0x70] sm:$0xff]  ;;  %v340_v2 = vld [vmem:[#allocation5 + $0x68] sm:$0xff]  ;;  %s1374_s28 = scalar_lea.vmem [#allocation8], %s817_s9  ;;  %s690_s8 = scalar_lea.sflag [#allocation4], %s1281_s1 }
  0x51   : > { %1093 = vsyncadd (%p1521_p12), [#allocation6], 4294963200  ;;  %832 = vmatpush.msra.mxu2 %v342_v0  ;;  %347 = vmatpush.msra.mxu0 %v342_v0  ;;  %v339_v3 = vld [vmem:[#allocation5 + $0x60] sm:$0xff]  ;;  %v338_v4 = vld [vmem:[#allocation5 + $0x58] sm:$0xff]  ;;  %s822_s26 = sshll.u32 (%p1206_p11), %s1175_s22, 5 }
  0x52   : > { %v337_v5 = vld [vmem:[#allocation5 + $0x50] sm:$0xff]  ;;  %v336_v6 = vld [vmem:[#allocation5 + $0x48] sm:$0xff]  ;;  %v335_v7 = vld [vmem:[#allocation5 + $0x40] sm:$0xff]  ;;  %s698_s25 = ssub.s32 (%p1206_p11), 63, %s822_s26 }
  0x53   : > { %833 = vmatpush.msra.mxu2 %v341_v1  ;;  %348 = vmatpush.msra.mxu0 %v341_v1  ;;  %v334_v8 = vld [vmem:[#allocation5 + $0x38] sm:$0xff]  ;;  %v333_v9 = vld [vmem:[#allocation5 + $0x30] sm:$0xff]  ;;  %v332_v10 = vld [vmem:[#allocation5 + $0x28] sm:$0xff]  ;;  %p699_p6 = scmp.lt.s32.totalorder (%p1206_p11), %s698_s25, 32 }
  0x54   : > { %v331_v11 = vld [vmem:[#allocation5 + $0x20] sm:$0xff]  ;;  %v330_v12 = vld [vmem:[#allocation5 + $0x18] sm:$0xff]  ;;  %v329_v13 = vld [vmem:[#allocation5 + $0x10] sm:$0xff] }
  0x55   : > { %834 = vmatpush.msra.mxu2 %v340_v2  ;;  %349 = vmatpush.msra.mxu0 %v340_v2  ;;  %v328_v14 = vld [vmem:[#allocation5 + $0x8] sm:$0xff]  ;;  %v327_v15 = vld [vmem:[#allocation5] sm:$0xff]  ;;  %v313_v20 = vld [vmem:[%s1287_s23 + $0x90] sm:$0xff] }
  0x56   : > { %v311_v16 = vld [vmem:[%s1287_s23 + $0x80] sm:$0xff]  ;;  %v312_v18 = vld [vmem:[%s1287_s23 + $0x88] sm:$0xff]  ;;  %v297_v21 = vld [vmem:[%s1287_s23 + $0x10] sm:$0xff] }
  0x57   : > { %835 = vmatpush.msra.mxu2 %v339_v3  ;;  %350 = vmatpush.msra.mxu0 %v339_v3  ;;  %v295_v17 = vld [vmem:[%s1287_s23] sm:$0xff]  ;;  %v296_v19 = vld [vmem:[%s1287_s23 + $0x8] sm:$0xff]  ;;  %v314_v22 = vld [vmem:[%s1287_s23 + $0x98] sm:$0xff] }
  0x58   : > { %v298_v23 = vld [vmem:[%s1287_s23 + $0x18] sm:$0xff]  ;;  %v315_v24 = vld [vmem:[%s1287_s23 + $0xa0] sm:$0xff]  ;;  %v316_v26 = vld [vmem:[%s1287_s23 + $0xa8] sm:$0xff] }
  0x59   : > { %836 = vmatpush.msra.mxu2 %v338_v4  ;;  %351 = vmatpush.msra.mxu0 %v338_v4  ;;  %v299_v25 = vld [vmem:[%s1287_s23 + $0x20] sm:$0xff]  ;;  %v300_v27 = vld [vmem:[%s1287_s23 + $0x28] sm:$0xff]  ;;  %v317_v28 = vld [vmem:[%s1287_s23 + $0xb0] sm:$0xff] }
  0x5a   : > { %v301_v29 = vld [vmem:[%s1287_s23 + $0x30] sm:$0xff]  ;;  %v318_v30 = vld [vmem:[%s1287_s23 + $0xb8] sm:$0xff]  ;;  %v319_v32 = vld [vmem:[%s1287_s23 + $0xc0] sm:$0xff] }
  0x5b   : > { %837 = vmatpush.msra.mxu2 %v337_v5  ;;  %352 = vmatpush.msra.mxu0 %v337_v5  ;;  %v302_v31 = vld [vmem:[%s1287_s23 + $0x38] sm:$0xff]  ;;  %v303_v33 = vld [vmem:[%s1287_s23 + $0x40] sm:$0xff]  ;;  %v320_v34 = vld [vmem:[%s1287_s23 + $0xc8] sm:$0xff] }
  0x5c   : > { %v304_v35 = vld [vmem:[%s1287_s23 + $0x48] sm:$0xff]  ;;  %v507_v36 = vld [vmem:[#allocation7 + $0x78] sm:$0xff]  ;;  %v506_v37 = vld [vmem:[#allocation7 + $0x70] sm:$0xff] }
  0x5d   : > { %838 = vmatpush.msra.mxu2 %v336_v6  ;;  %353 = vmatpush.msra.mxu0 %v336_v6  ;;  %v505_v38 = vld [vmem:[#allocation7 + $0x68] sm:$0xff]  ;;  %v504_v39 = vld [vmem:[#allocation7 + $0x60] sm:$0xff]  ;;  %v321_v40 = vld [vmem:[%s1287_s23 + $0xd0] sm:$0xff] }
  0x5e   : > { %848 = vmatpush.msra.mxu3 %v507_v36  ;;  %512 = vmatpush.msra.mxu1 %v507_v36  ;;  %v305_v41 = vld [vmem:[%s1287_s23 + $0x50] sm:$0xff]  ;;  %v503_v42 = vld [vmem:[#allocation7 + $0x58] sm:$0xff]  ;;  %v501_v44 = vld [vmem:[#allocation7 + $0x48] sm:$0xff] }
  0x5f   : > { %839 = vmatpush.msra.mxu2 %v335_v7  ;;  %354 = vmatpush.msra.mxu0 %v335_v7  ;;  %v502_v43 = vld [vmem:[#allocation7 + $0x50] sm:$0xff]  ;;  %v500_v45 = vld [vmem:[#allocation7 + $0x40] sm:$0xff]  ;;  %v322_v46 = vld [vmem:[%s1287_s23 + $0xd8] sm:$0xff] }
  0x60   : > { %849 = vmatpush.msra.mxu3 %v506_v37  ;;  %513 = vmatpush.msra.mxu1 %v506_v37  ;;  %v306_v47 = vld [vmem:[%s1287_s23 + $0x58] sm:$0xff]  ;;  %v498_v49 = vld [vmem:[#allocation7 + $0x30] sm:$0xff]  ;;  %v497_v50 = vld [vmem:[#allocation7 + $0x28] sm:$0xff] }
  0x61   : > { %840 = vmatpush.msra.mxu2 %v334_v8  ;;  %355 = vmatpush.msra.mxu0 %v334_v8  ;;  %v499_v48 = vld [vmem:[#allocation7 + $0x38] sm:$0xff]  ;;  %v496_v51 = vld [vmem:[#allocation7 + $0x20] sm:$0xff]  ;;  %v494_v55 = vld [vmem:[#allocation7 + $0x10] sm:$0xff] }
  0x62   : > { %850 = vmatpush.msra.mxu3 %v505_v38  ;;  %514 = vmatpush.msra.mxu1 %v505_v38  ;;  %v323_v52 = vld [vmem:[%s1287_s23 + $0xe0] sm:$0xff]  ;;  %v495_v54 = vld [vmem:[#allocation7 + $0x18] sm:$0xff]  ;;  %v493_v56 = vld [vmem:[#allocation7 + $0x8] sm:$0xff] }
  0x63   : > { %841 = vmatpush.msra.mxu2 %v333_v9  ;;  %356 = vmatpush.msra.mxu0 %v333_v9  ;;  %v307_v53 = vld [vmem:[%s1287_s23 + $0x60] sm:$0xff]  ;;  %v324_v57 = vld [vmem:[%s1287_s23 + $0xe8] sm:$0xff]  ;;  %v325_v60 = vld [vmem:[%s1287_s23 + $0xf0] sm:$0xff] }
  0x64   : > { %851 = vmatpush.msra.mxu3 %v504_v39  ;;  %515 = vmatpush.msra.mxu1 %v504_v39  ;;  %v308_v58 = vld [vmem:[%s1287_s23 + $0x68] sm:$0xff]  ;;  %v492_v59 = vld [vmem:[#allocation7] sm:$0xff]  ;;  %v309_v61 = vld [vmem:[%s1287_s23 + $0x70] sm:$0xff] }
  0x65   : > { %842 = vmatpush.msra.mxu2 %v332_v10  ;;  %357 = vmatpush.msra.mxu0 %v332_v10  ;;  %v326_v62 = vld [vmem:[%s1287_s23 + $0xf8] sm:$0xff]  ;;  %v1332_v0 = vld [vmem:[%s1504_s2] ss:$0 sm:$0xff] }
  0x66   : > { %852 = vmatpush.msra.mxu3 %v503_v42  ;;  %516 = vmatpush.msra.mxu1 %v503_v42  ;;  %v310_v63 = vld [vmem:[%s1287_s23 + $0x78] sm:$0xff] }
  0x67   : > { %843 = vmatpush.msra.mxu2 %v331_v11  ;;  %358 = vmatpush.msra.mxu0 %v331_v11 }
  0x68   : > { %853 = vmatpush.msra.mxu3 %v502_v43  ;;  %517 = vmatpush.msra.mxu1 %v502_v43 }
  0x69   : > { %844 = vmatpush.msra.mxu2 %v330_v12  ;;  %359 = vmatpush.msra.mxu0 %v330_v12 }
  0x6a   : > { %854 = vmatpush.msra.mxu3 %v501_v44  ;;  %518 = vmatpush.msra.mxu1 %v501_v44 }
  0x6b   : > { %845 = vmatpush.msra.mxu2 %v329_v13  ;;  %360 = vmatpush.msra.mxu0 %v329_v13 }
  0x6c   : > { %855 = vmatpush.msra.mxu3 %v500_v45  ;;  %519 = vmatpush.msra.mxu1 %v500_v45 }
  0x6d   : > { %846 = vmatpush.msra.mxu2 %v328_v14  ;;  %361 = vmatpush.msra.mxu0 %v328_v14 }
  0x6e   : > { %856 = vmatpush.msra.mxu3 %v499_v48  ;;  %520 = vmatpush.msra.mxu1 %v499_v48 }
  0x6f   : > { %847 = vmatpush.msra.mxu2 %v327_v15  ;;  %362 = vmatpush.msra.mxu0 %v327_v15 }
  0x70   : > { %411 = vmatmul.f32.vlgmr.msra.gmra.mxu2 %v311_v16  ;;  %363 = vmatmul.f32.vlgmr.msra.gmra.mxu0 %v295_v17 }
  0x71   : > { %857 = vmatpush.msra.mxu3 %v498_v49  ;;  %521 = vmatpush.msra.mxu1 %v498_v49 }
  0x73   : > { %858 = vmatpush.msra.mxu3 %v497_v50  ;;  %522 = vmatpush.msra.mxu1 %v497_v50 }
  0x75   : > { %859 = vmatpush.msra.mxu3 %v496_v51  ;;  %523 = vmatpush.msra.mxu1 %v496_v51 }
  0x77   : > { %860 = vmatpush.msra.mxu3 %v495_v54  ;;  %524 = vmatpush.msra.mxu1 %v495_v54 }
  0x78   : > { %414 = vmatmul.f32.gmra.mxu2 %v312_v18  ;;  %366 = vmatmul.f32.gmra.mxu0 %v296_v19 }
  0x79   : > { %861 = vmatpush.msra.mxu3 %v494_v55  ;;  %525 = vmatpush.msra.mxu1 %v494_v55 }
  0x7b   : > { %862 = vmatpush.msra.mxu3 %v493_v56  ;;  %526 = vmatpush.msra.mxu1 %v493_v56 }
  0x7d   : > { %863 = vmatpush.msra.mxu3 %v492_v59  ;;  %527 = vmatpush.msra.mxu1 %v492_v59 }
  0x80   : > { %417 = vmatmul.f32.gmra.mxu2 %v313_v20  ;;  %369 = vmatmul.f32.gmra.mxu0 %v297_v21 }
  0x88   : > { %420 = vmatmul.f32.gmra.mxu2 %v314_v22  ;;  %372 = vmatmul.f32.gmra.mxu0 %v298_v23 }
  0x90   : > { %423 = vmatmul.f32.gmra.mxu2 %v315_v24  ;;  %375 = vmatmul.f32.gmra.mxu0 %v299_v25 }
  0x98   : > { %426 = vmatmul.f32.gmra.mxu2 %v316_v26  ;;  %378 = vmatmul.f32.gmra.mxu0 %v300_v27 }
  0xa0   : > { %429 = vmatmul.f32.gmra.mxu2 %v317_v28  ;;  %381 = vmatmul.f32.gmra.mxu0 %v301_v29 }
  0xa8   : > { %432 = vmatmul.f32.gmra.mxu2 %v318_v30  ;;  %384 = vmatmul.f32.gmra.mxu0 %v302_v31 }
  0xb0   : > { %435 = vmatmul.f32.gmra.mxu2 %v319_v32  ;;  %387 = vmatmul.f32.gmra.mxu0 %v303_v33 }
  0xb8   : > { %438 = vmatmul.f32.gmra.mxu2 %v320_v34  ;;  %390 = vmatmul.f32.gmra.mxu0 %v304_v35 }
  0xc0   : > { %441 = vmatmul.f32.gmra.mxu2 %v321_v40  ;;  %393 = vmatmul.f32.gmra.mxu0 %v305_v41 }
  0xc8   : > { %444 = vmatmul.f32.gmra.mxu2 %v322_v46  ;;  %396 = vmatmul.f32.gmra.mxu0 %v306_v47 }
  0xd0   : > { %447 = vmatmul.f32.gmra.mxu2 %v323_v52  ;;  %399 = vmatmul.f32.gmra.mxu0 %v307_v53 }
  0xd8   : > { %450 = vmatmul.f32.gmra.mxu2 %v324_v57  ;;  %402 = vmatmul.f32.gmra.mxu0 %v308_v58 }
  0xe0   : > { %453 = vmatmul.f32.gmra.mxu2 %v325_v60  ;;  %405 = vmatmul.f32.gmra.mxu0 %v309_v61 }
  0xe8   : > { %456 = vmatmul.f32.gmra.mxu2 %v326_v62  ;;  %408 = vmatmul.f32.gmra.mxu0 %v310_v63 }
  0xed   : > { %v364_v1 = vpop.f32.mrf.mxu0 }
  0xee   : > { %v365_v2 = vadd.f32 %v1332_v0, %v364_v1 }
  0xf0   : > { %v460_v3 = vmax.f32 %v365_v2, 0.0 }
  0xf2   : > { %528 = vmatmul.f32.vlgmr.msra.gmra.mxu1 %v460_v3 }
  0xf3   : > { %v412_v4 = vpop.f32.mrf.mxu2 }
  0xf4   : > { %v413_v5 = vadd.f32 %v1332_v0, %v412_v4 }
  0xf5   : > { %v367_v6 = vpop.f32.mrf.mxu0 }
  0xf6   : > { %v476_v7 = vmax.f32 %v413_v5, 0.0  ;;  %v368_v8 = vadd.f32 %v1332_v0, %v367_v6 }
  0xf8   : > { %576 = vmatmul.f32.vlgmr.msra.gmra.mxu3 %v476_v7  ;;  %v461_v9 = vmax.f32 %v368_v8, 0.0 }
  0xfa   : > { %531 = vmatmul.f32.gmra.mxu1 %v461_v9 }
  0xfb   : > { %v415_v10 = vpop.f32.mrf.mxu2 }
  0xfc   : > { %v416_v11 = vadd.f32 %v1332_v0, %v415_v10 }
  0xfd   : > { %v370_v12 = vpop.f32.mrf.mxu0 }
  0xfe   : > { %v477_v13 = vmax.f32 %v416_v11, 0.0  ;;  %v371_v14 = vadd.f32 %v1332_v0, %v370_v12 }
 0x100   : > { %579 = vmatmul.f32.gmra.mxu3 %v477_v13  ;;  %v462_v15 = vmax.f32 %v371_v14, 0.0 }
 0x102   : > { %534 = vmatmul.f32.gmra.mxu1 %v462_v15 }
 0x103   : > { %v418_v16 = vpop.f32.mrf.mxu2 }
 0x104   : > { %v419_v17 = vadd.f32 %v1332_v0, %v418_v16 }
 0x105   : > { %v373_v18 = vpop.f32.mrf.mxu0 }
 0x106   : > { %v478_v19 = vmax.f32 %v419_v17, 0.0  ;;  %v374_v20 = vadd.f32 %v1332_v0, %v373_v18 }
 0x108   : > { %582 = vmatmul.f32.gmra.mxu3 %v478_v19  ;;  %v463_v21 = vmax.f32 %v374_v20, 0.0 }
 0x10a   : > { %537 = vmatmul.f32.gmra.mxu1 %v463_v21 }
 0x10b   : > { %v421_v22 = vpop.f32.mrf.mxu2 }
 0x10c   : > { %v422_v23 = vadd.f32 %v1332_v0, %v421_v22 }
 0x10d   : > { %v376_v24 = vpop.f32.mrf.mxu0 }
 0x10e   : > { %v479_v25 = vmax.f32 %v422_v23, 0.0  ;;  %v377_v26 = vadd.f32 %v1332_v0, %v376_v24 }
 0x110   : > { %585 = vmatmul.f32.gmra.mxu3 %v479_v25  ;;  %v464_v27 = vmax.f32 %v377_v26, 0.0 }
 0x112   : > { %540 = vmatmul.f32.gmra.mxu1 %v464_v27 }
 0x113   : > { %v424_v28 = vpop.f32.mrf.mxu2 }
 0x114   : > { %v425_v29 = vadd.f32 %v1332_v0, %v424_v28 }
 0x115   : > { %v379_v30 = vpop.f32.mrf.mxu0 }
 0x116   : > { %v480_v31 = vmax.f32 %v425_v29, 0.0  ;;  %v380_v32 = vadd.f32 %v1332_v0, %v379_v30 }
 0x118   : > { %588 = vmatmul.f32.gmra.mxu3 %v480_v31  ;;  %v465_v33 = vmax.f32 %v380_v32, 0.0 }
 0x11a   : > { %543 = vmatmul.f32.gmra.mxu1 %v465_v33  ;;  %v1369_v33 = vld [vmem:[%s1506_s4] ss:$0 sm:$0xff] }
 0x11b   : > { %v427_v34 = vpop.f32.mrf.mxu2 }
 0x11c   : > { %v428_v35 = vadd.f32 %v1332_v0, %v427_v34 }
 0x11d   : > { %v382_v36 = vpop.f32.mrf.mxu0 }
 0x11e   : > { %v481_v37 = vmax.f32 %v428_v35, 0.0  ;;  %v383_v38 = vadd.f32 %v1332_v0, %v382_v36 }
 0x120   : > { %591 = vmatmul.f32.gmra.mxu3 %v481_v37  ;;  %v466_v39 = vmax.f32 %v383_v38, 0.0 }
 0x122   : > { %546 = vmatmul.f32.gmra.mxu1 %v466_v39 }
 0x123   : > { %v430_v40 = vpop.f32.mrf.mxu2 }
 0x124   : > { %v431_v41 = vadd.f32 %v1332_v0, %v430_v40 }
 0x125   : > { %v385_v42 = vpop.f32.mrf.mxu0 }
 0x126   : > { %v482_v43 = vmax.f32 %v431_v41, 0.0  ;;  %v386_v44 = vadd.f32 %v1332_v0, %v385_v42 }
 0x128   : > { %594 = vmatmul.f32.gmra.mxu3 %v482_v43  ;;  %v467_v45 = vmax.f32 %v386_v44, 0.0 }
 0x12a   : > { %549 = vmatmul.f32.gmra.mxu1 %v467_v45 }
 0x12b   : > { %v433_v46 = vpop.f32.mrf.mxu2 }
 0x12c   : > { %v434_v47 = vadd.f32 %v1332_v0, %v433_v46 }
 0x12d   : > { %v388_v48 = vpop.f32.mrf.mxu0 }
 0x12e   : > { %v483_v49 = vmax.f32 %v434_v47, 0.0  ;;  %v389_v50 = vadd.f32 %v1332_v0, %v388_v48 }
 0x130   : > { %597 = vmatmul.f32.gmra.mxu3 %v483_v49  ;;  %v468_v51 = vmax.f32 %v389_v50, 0.0 }
 0x132   : > { %552 = vmatmul.f32.gmra.mxu1 %v468_v51 }
 0x133   : > { %v436_v52 = vpop.f32.mrf.mxu2 }
 0x134   : > { %v437_v53 = vadd.f32 %v1332_v0, %v436_v52 }
 0x135   : > { %v391_v54 = vpop.f32.mrf.mxu0 }
 0x136   : > { %v484_v55 = vmax.f32 %v437_v53, 0.0  ;;  %v392_v56 = vadd.f32 %v1332_v0, %v391_v54 }
 0x138   : > { %600 = vmatmul.f32.gmra.mxu3 %v484_v55  ;;  %v469_v57 = vmax.f32 %v392_v56, 0.0 }
 0x13a   : > { %555 = vmatmul.f32.gmra.mxu1 %v469_v57 }
 0x13b   : > { %v439_v58 = vpop.f32.mrf.mxu2 }
 0x13c   : > { %v440_v59 = vadd.f32 %v1332_v0, %v439_v58 }
 0x13d   : > { %v394_v60 = vpop.f32.mrf.mxu0 }
 0x13e   : > { %v485_v61 = vmax.f32 %v440_v59, 0.0  ;;  %v395_v62 = vadd.f32 %v1332_v0, %v394_v60 }
 0x140   : > { %603 = vmatmul.f32.gmra.mxu3 %v485_v61  ;;  %v470_v63 = vmax.f32 %v395_v62, 0.0 }
 0x142   : > { %558 = vmatmul.f32.gmra.mxu1 %v470_v63 }
 0x143   : > { %v442_v1 = vpop.f32.mrf.mxu2 }
 0x144   : > { %v443_v2 = vadd.f32 %v1332_v0, %v442_v1 }
 0x145   : > { %v397_v3 = vpop.f32.mrf.mxu0 }
 0x146   : > { %v486_v4 = vmax.f32 %v443_v2, 0.0  ;;  %v398_v5 = vadd.f32 %v1332_v0, %v397_v3 }
 0x148   : > { %606 = vmatmul.f32.gmra.mxu3 %v486_v4  ;;  %v471_v6 = vmax.f32 %v398_v5, 0.0 }
 0x14a   : > { %561 = vmatmul.f32.gmra.mxu1 %v471_v6 }
 0x14b   : > { %v445_v7 = vpop.f32.mrf.mxu2 }
 0x14c   : > { %v446_v8 = vadd.f32 %v1332_v0, %v445_v7 }
 0x14d   : > { %v400_v9 = vpop.f32.mrf.mxu0 }
 0x14e   : > { %v487_v10 = vmax.f32 %v446_v8, 0.0  ;;  %v401_v11 = vadd.f32 %v1332_v0, %v400_v9 }
 0x150   : > { %609 = vmatmul.f32.gmra.mxu3 %v487_v10  ;;  %v472_v12 = vmax.f32 %v401_v11, 0.0 }
 0x152   : > { %564 = vmatmul.f32.gmra.mxu1 %v472_v12 }
 0x153   : > { %v448_v13 = vpop.f32.mrf.mxu2 }
 0x154   : > { %v449_v14 = vadd.f32 %v1332_v0, %v448_v13 }
 0x155   : > { %v403_v15 = vpop.f32.mrf.mxu0 }
 0x156   : > { %v488_v16 = vmax.f32 %v449_v14, 0.0  ;;  %v404_v17 = vadd.f32 %v1332_v0, %v403_v15 }
 0x158   : > { %612 = vmatmul.f32.gmra.mxu3 %v488_v16  ;;  %v473_v18 = vmax.f32 %v404_v17, 0.0 }
 0x15a   : > { %567 = vmatmul.f32.gmra.mxu1 %v473_v18 }
 0x15b   : > { %v451_v19 = vpop.f32.mrf.mxu2 }
 0x15c   : > { %v452_v20 = vadd.f32 %v1332_v0, %v451_v19 }
 0x15d   : > { %v406_v21 = vpop.f32.mrf.mxu0 }
 0x15e   : > { %v489_v22 = vmax.f32 %v452_v20, 0.0  ;;  %v407_v23 = vadd.f32 %v1332_v0, %v406_v21 }
 0x160   : > { %615 = vmatmul.f32.gmra.mxu3 %v489_v22  ;;  %v474_v24 = vmax.f32 %v407_v23, 0.0 }
 0x162   : > { %570 = vmatmul.f32.gmra.mxu1 %v474_v24 }
 0x163   : > { %v454_v25 = vpop.f32.mrf.mxu2 }
 0x164   : > { %v455_v26 = vadd.f32 %v1332_v0, %v454_v25 }
 0x165   : > { %v409_v27 = vpop.f32.mrf.mxu0 }
 0x166   : > { %v490_v28 = vmax.f32 %v455_v26, 0.0  ;;  %v410_v29 = vadd.f32 %v1332_v0, %v409_v27 }
 0x168   : > { %618 = vmatmul.f32.gmra.mxu3 %v490_v28  ;;  %v475_v30 = vmax.f32 %v410_v29, 0.0 }
 0x16a   : > { %573 = vmatmul.f32.gmra.mxu1 %v475_v30 }
 0x16b   : > { %v457_v31 = vpop.f32.mrf.mxu2 }
 0x16c   : > { %v458_v32 = vadd.f32 %v1332_v0, %v457_v31 }
 0x16e   : > { %v491_v34 = vmax.f32 %v458_v32, 0.0 }
 0x16f   : > { %v529_v35 = vpop.f32.mrf.mxu1 }
 0x170   : > { %621 = vmatmul.f32.gmra.mxu3 %v491_v34  ;;  %v530_v36 = vadd.f32 %v1369_v33, %v529_v35 }
 0x172   : > { %v625_v37 = vmax.f32 %v530_v36, 0.0 }
 0x174   : > { %657 = vst [vmem:[%s1374_s28] sm:$0xff] %v625_v37 }
 0x177   : > { %v532_v0 = vpop.f32.mrf.mxu1 }
 0x178   : > { %v533_v38 = vadd.f32 %v1369_v33, %v532_v0 }
 0x17a   : > { %v626_v39 = vmax.f32 %v533_v38, 0.0 }
 0x17b   : > { %v577_v40 = vpop.f32.mrf.mxu3 }
 0x17c   : > { %v578_v41 = vadd.f32 %v1369_v33, %v577_v40  ;;  %658 = vst [vmem:[%s1374_s28 + $0x8] sm:$0xff] %v626_v39 }
 0x17e   : > { %v641_v42 = vmax.f32 %v578_v41, 0.0 }
 0x17f   : > { %v535_v43 = vpop.f32.mrf.mxu1 }
 0x180   : > { %673 = vst [vmem:[%s1374_s28 + $0x80] sm:$0xff] %v641_v42  ;;  %v536_v44 = vadd.f32 %v1369_v33, %v535_v43 }
 0x182   : > { %v627_v45 = vmax.f32 %v536_v44, 0.0 }
 0x183   : > { %v580_v46 = vpop.f32.mrf.mxu3 }
 0x184   : > { %v581_v47 = vadd.f32 %v1369_v33, %v580_v46  ;;  %659 = vst [vmem:[%s1374_s28 + $0x10] sm:$0xff] %v627_v45 }
 0x186   : > { %v642_v48 = vmax.f32 %v581_v47, 0.0 }
 0x187   : > { %v538_v49 = vpop.f32.mrf.mxu1 }
 0x188   : > { %674 = vst [vmem:[%s1374_s28 + $0x88] sm:$0xff] %v642_v48  ;;  %v539_v50 = vadd.f32 %v1369_v33, %v538_v49 }
 0x18a   : > { %v628_v51 = vmax.f32 %v539_v50, 0.0 }
 0x18b   : > { %v583_v52 = vpop.f32.mrf.mxu3 }
 0x18c   : > { %v584_v53 = vadd.f32 %v1369_v33, %v583_v52  ;;  %660 = vst [vmem:[%s1374_s28 + $0x18] sm:$0xff] %v628_v51 }
 0x18e   : > { %v643_v54 = vmax.f32 %v584_v53, 0.0 }
 0x18f   : > { %v541_v55 = vpop.f32.mrf.mxu1 }
 0x190   : > { %675 = vst [vmem:[%s1374_s28 + $0x90] sm:$0xff] %v643_v54  ;;  %v542_v56 = vadd.f32 %v1369_v33, %v541_v55 }
 0x192   : > { %v629_v57 = vmax.f32 %v542_v56, 0.0 }
 0x193   : > { %v586_v58 = vpop.f32.mrf.mxu3 }
 0x194   : > { %v587_v59 = vadd.f32 %v1369_v33, %v586_v58  ;;  %661 = vst [vmem:[%s1374_s28 + $0x20] sm:$0xff] %v629_v57 }
 0x196   : > { %v644_v60 = vmax.f32 %v587_v59, 0.0 }
 0x197   : > { %v544_v61 = vpop.f32.mrf.mxu1 }
 0x198   : > { %676 = vst [vmem:[%s1374_s28 + $0x98] sm:$0xff] %v644_v60  ;;  %v545_v62 = vadd.f32 %v1369_v33, %v544_v61 }
 0x19a   : > { %v630_v63 = vmax.f32 %v545_v62, 0.0 }
 0x19b   : > { %v589_v1 = vpop.f32.mrf.mxu3 }
 0x19c   : > { %v590_v2 = vadd.f32 %v1369_v33, %v589_v1  ;;  %662 = vst [vmem:[%s1374_s28 + $0x28] sm:$0xff] %v630_v63 }
 0x19e   : > { %v645_v3 = vmax.f32 %v590_v2, 0.0 }
 0x19f   : > { %v547_v4 = vpop.f32.mrf.mxu1 }
 0x1a0   : > { %677 = vst [vmem:[%s1374_s28 + $0xa0] sm:$0xff] %v645_v3  ;;  %v548_v5 = vadd.f32 %v1369_v33, %v547_v4 }
 0x1a2   : > { %v631_v6 = vmax.f32 %v548_v5, 0.0 }
 0x1a3   : > { %v592_v7 = vpop.f32.mrf.mxu3 }
 0x1a4   : > { %v593_v8 = vadd.f32 %v1369_v33, %v592_v7  ;;  %663 = vst [vmem:[%s1374_s28 + $0x30] sm:$0xff] %v631_v6 }
 0x1a6   : > { %v646_v9 = vmax.f32 %v593_v8, 0.0 }
 0x1a7   : > { %v550_v10 = vpop.f32.mrf.mxu1 }
 0x1a8   : > { %678 = vst [vmem:[%s1374_s28 + $0xa8] sm:$0xff] %v646_v9  ;;  %v551_v11 = vadd.f32 %v1369_v33, %v550_v10 }
 0x1aa   : > { %v632_v12 = vmax.f32 %v551_v11, 0.0 }
 0x1ab   : > { %v595_v13 = vpop.f32.mrf.mxu3 }
 0x1ac   : > { %v596_v14 = vadd.f32 %v1369_v33, %v595_v13  ;;  %664 = vst [vmem:[%s1374_s28 + $0x38] sm:$0xff] %v632_v12 }
 0x1ae   : > { %v647_v15 = vmax.f32 %v596_v14, 0.0 }
 0x1af   : > { %v553_v16 = vpop.f32.mrf.mxu1 }
 0x1b0   : > { %679 = vst [vmem:[%s1374_s28 + $0xb0] sm:$0xff] %v647_v15  ;;  %v554_v17 = vadd.f32 %v1369_v33, %v553_v16 }
 0x1b2   : > { %v633_v18 = vmax.f32 %v554_v17, 0.0 }
 0x1b3   : > { %v598_v19 = vpop.f32.mrf.mxu3 }
 0x1b4   : > { %v599_v20 = vadd.f32 %v1369_v33, %v598_v19  ;;  %665 = vst [vmem:[%s1374_s28 + $0x40] sm:$0xff] %v633_v18 }
 0x1b6   : > { %v648_v21 = vmax.f32 %v599_v20, 0.0 }
 0x1b7   : > { %v556_v22 = vpop.f32.mrf.mxu1 }
 0x1b8   : > { %680 = vst [vmem:[%s1374_s28 + $0xb8] sm:$0xff] %v648_v21  ;;  %v557_v23 = vadd.f32 %v1369_v33, %v556_v22 }
 0x1ba   : > { %v634_v24 = vmax.f32 %v557_v23, 0.0 }
 0x1bb   : > { %v601_v25 = vpop.f32.mrf.mxu3 }
 0x1bc   : > { %v602_v26 = vadd.f32 %v1369_v33, %v601_v25  ;;  %666 = vst [vmem:[%s1374_s28 + $0x48] sm:$0xff] %v634_v24 }
 0x1be   : > { %v649_v27 = vmax.f32 %v602_v26, 0.0 }
 0x1bf   : > { %v559_v28 = vpop.f32.mrf.mxu1 }
 0x1c0   : > { %681 = vst [vmem:[%s1374_s28 + $0xc0] sm:$0xff] %v649_v27  ;;  %v560_v29 = vadd.f32 %v1369_v33, %v559_v28 }
 0x1c2   : > { %v635_v30 = vmax.f32 %v560_v29, 0.0 }
 0x1c3   : > { %v604_v31 = vpop.f32.mrf.mxu3 }
 0x1c4   : > { %v605_v32 = vadd.f32 %v1369_v33, %v604_v31  ;;  %667 = vst [vmem:[%s1374_s28 + $0x50] sm:$0xff] %v635_v30 }
 0x1c6   : > { %v650_v34 = vmax.f32 %v605_v32, 0.0 }
 0x1c7   : > { %v562_v35 = vpop.f32.mrf.mxu1 }
 0x1c8   : > { %682 = vst [vmem:[%s1374_s28 + $0xc8] sm:$0xff] %v650_v34  ;;  %v563_v36 = vadd.f32 %v1369_v33, %v562_v35 }
 0x1ca   : > { %v636_v37 = vmax.f32 %v563_v36, 0.0 }
 0x1cb   : > { %v607_v0 = vpop.f32.mrf.mxu3 }
 0x1cc   : > { %v608_v38 = vadd.f32 %v1369_v33, %v607_v0  ;;  %668 = vst [vmem:[%s1374_s28 + $0x58] sm:$0xff] %v636_v37 }
 0x1ce   : > { %v651_v39 = vmax.f32 %v608_v38, 0.0 }
 0x1cf   : > { %v565_v40 = vpop.f32.mrf.mxu1 }
 0x1d0   : > { %683 = vst [vmem:[%s1374_s28 + $0xd0] sm:$0xff] %v651_v39  ;;  %v566_v41 = vadd.f32 %v1369_v33, %v565_v40 }
 0x1d2   : > { %v637_v42 = vmax.f32 %v566_v41, 0.0 }
 0x1d3   : > { %v610_v43 = vpop.f32.mrf.mxu3 }
 0x1d4   : > { %v611_v44 = vadd.f32 %v1369_v33, %v610_v43  ;;  %669 = vst [vmem:[%s1374_s28 + $0x60] sm:$0xff] %v637_v42 }
 0x1d6   : > { %v652_v45 = vmax.f32 %v611_v44, 0.0 }
 0x1d7   : > { %v568_v46 = vpop.f32.mrf.mxu1 }
 0x1d8   : > { %684 = vst [vmem:[%s1374_s28 + $0xd8] sm:$0xff] %v652_v45  ;;  %v569_v47 = vadd.f32 %v1369_v33, %v568_v46 }
 0x1da   : > { %v638_v48 = vmax.f32 %v569_v47, 0.0 }
 0x1db   : > { %v613_v49 = vpop.f32.mrf.mxu3 }
 0x1dc   : > { %v614_v50 = vadd.f32 %v1369_v33, %v613_v49  ;;  %670 = vst [vmem:[%s1374_s28 + $0x68] sm:$0xff] %v638_v48 }
 0x1de   : > { %v653_v51 = vmax.f32 %v614_v50, 0.0 }
 0x1df   : > { %v571_v52 = vpop.f32.mrf.mxu1 }
 0x1e0   : > { %685 = vst [vmem:[%s1374_s28 + $0xe0] sm:$0xff] %v653_v51  ;;  %v572_v53 = vadd.f32 %v1369_v33, %v571_v52 }
 0x1e2   : > { %v639_v54 = vmax.f32 %v572_v53, 0.0 }
 0x1e3   : > { %v616_v55 = vpop.f32.mrf.mxu3 }
 0x1e4   : > { %v617_v56 = vadd.f32 %v1369_v33, %v616_v55  ;;  %671 = vst [vmem:[%s1374_s28 + $0x70] sm:$0xff] %v639_v54 }
 0x1e6   : > { %v654_v57 = vmax.f32 %v617_v56, 0.0 }
 0x1e7   : > { %v574_v58 = vpop.f32.mrf.mxu1 }
 0x1e8   : > { %686 = vst [vmem:[%s1374_s28 + $0xe8] sm:$0xff] %v654_v57  ;;  %v575_v59 = vadd.f32 %v1369_v33, %v574_v58 }
 0x1ea   : > { %v640_v60 = vmax.f32 %v575_v59, 0.0 }
 0x1eb   : > { %v619_v61 = vpop.f32.mrf.mxu3 }
 0x1ec   : > { %v620_v62 = vadd.f32 %v1369_v33, %v619_v61  ;;  %672 = vst [vmem:[%s1374_s28 + $0x78] sm:$0xff] %v640_v60 }
 0x1ee   : > { %v655_v63 = vmax.f32 %v620_v62, 0.0 }
 0x1f0   : > { %687 = vst [vmem:[%s1374_s28 + $0xf0] sm:$0xff] %v655_v63 }
 0x1f3   : > { %v622_v1 = vpop.f32.mrf.mxu3 }
 0x1f4   : > { %v623_v2 = vadd.f32 %v1369_v33, %v622_v1  ;;  %696 = sbr.rel (!%p1206_p11) target bundleno = 536 (0x218), region = 56 }
 0x1f6   : > { %v656_v3 = vmax.f32 %v623_v2, 0.0 }
 0x1f8   : > { %688 = vst [vmem:[%s1374_s28 + $0xf8] sm:$0xff] %v656_v3 }
 0x1f9   : > { %s1532_s25 = smov (!%p699_p6, %s698_s25), 32 }
 0x1fa   : > { %s823_s17 = sshll.u32 %s1532_s25, 3 }
 0x1fb   : > { %s702_s16 = ssub.s32 256, %s823_s17 }
 0x1fc   : > { %s703_s12 = sshll.u32 %s702_s16, 4 }
 0x1fd   : > { %704 = vsyncadd %s690_s8, %s703_s12  ;;  %p1448_p13 = scmp.ne.s32.totalorder %s823_s17, 0  ;;  %s831_s13 = sshll.u32 %s1175_s22, 8 }
 0x1fe   : > { %s707_s10 = scalar_lea.hbm %s1507_s5, %s831_s13  ;;  %s709_s23 = sshll.u32 %s1374_s28, 4  ;;  %s1457_s23 = int_to_ptr.vmem [resolvable:$true] %s709_s23 }
 0x1ff   : > { %s711_s29 = sshll.u32 %s707_s10, 4  ;;  %s827_s7 = sshll.u32 %s1532_s25, 7  ;;  %s1459_s29 = int_to_ptr.hbm [resolvable:$true] %s711_s29 }
 0x200   : > { %s1031_s11 = sshra.s32 %s1457_s23, 4  ;;  %s1033_s14 = sshrl.u32 %s827_s7, 4  ;;  %s1032_s11 = int_to_ptr.vmem [resolvable:$true] %s1031_s11 }
 0x201   : > { %s1038_s26 = scalar_lea.vmem %s1032_s11, %s1033_s14  ;;  %s1121_s22 = smov [#allocation8]  }
 0x202   : > { %p1039_p11 = scmp.ne.s32.totalorder %s1032_s11, %s1038_s26  ;;  %s1042_s17 = scalar_lea.vmem %s1121_s22, 512 }
 0x203   : > { %p1044_p9 = scmp.lt.s32.totalorder %s1042_s17, %s1038_s26 }
 0x204   : > { %p1040_p2 = pnand %p1039_p11, %p1448_p13 }
 0x206   : > { %p1041_p5 = pneg %p1040_p2 }
 0x208   : > { %p1046_p10 = pnand %p1044_p9, %p1041_p5 }
 0x20a   : > { %1049 = shalt.err (!%p1046_p10)
}
 0x20b   : > { %s1050_s28 = sshra.s32 %s1459_s29, 4  ;;  %s1061_s15 = scalar_lea.hbm %s1507_s5, 504  ;;  %s1051_s28 = int_to_ptr.hbm [resolvable:$true] %s1050_s28 }
 0x20c   : > { %s1057_s16 = scalar_lea.hbm %s1051_s28, %s1033_s14  ;;  %p1062_p7 = scmp.lt.s32.totalorder %s1051_s28, %s1507_s5 }
 0x20d   : > { %p1058_p1 = scmp.ne.s32.totalorder %s1051_s28, %s1057_s16  ;;  %p1063_p8 = scmp.lt.s32.totalorder %s1061_s15, %s1057_s16 }
 0x20f   : > { %p1059_p0 = pnand %p1058_p1, %p1448_p13  ;;  %p1064_p4 = por %p1063_p8, %p1062_p7 }
 0x211   : > { %p1060_p3 = pneg %p1059_p0 }
 0x213   : > { %p1065_p12 = pnand %p1064_p4, %p1060_p3 }
 0x215   : > { %1068 = shalt.err (!%p1065_p12)
}
 0x216   : > { %s1122_s11 = smov 128   ;;  %s1123_s14 = smov 8  }
 0x217   : > { %717 = dma.vmem_to_hbm [thread:$0]  (%p1448_p13), %s1457_s23, %s827_s7, %s1459_s29, %s690_s8, %s1122_s11, %s1122_s11, %s1123_s14  }
 0x218 PF: > { %s726_s26 = sand.u32 1, %s1100_s18   ;;  %p1523_p6 = scmp.ne.s32.totalorder %s1515_s6, 0 }
 0x219   : > { %p1524_p11 = scmp.ge.s32.totalorder %s1112_s21, 2  ;;  %s727_s22 = scalar_lea.sflag [#allocation4], %s726_s26 }
 0x21b   : > { %p882_p2 = pnand %p1524_p11, %p1523_p6 }
 0x21d   : > { %p883_p5 = pneg %p882_p2 }
 0x21f   : > { %1095 = dma.done.wait (%p883_p5), %s727_s22, 4096  }
 0x220   : > { %1097 = vsyncadd (%p883_p5), %s727_s22, 4294963200  ;;  %p19_p9 = scmp.ge.s32.totalorder %s1179_s24, 4   ;;  %s1525_s18 = smov %s1104_s19 }
 0x221   : > { %s1526_s19 = smov %s1108_s20  ;;  %s1527_s20 = smov %s1191_s27 }
 0x222   : > { %s1528_s21 = smov %s1179_s24  ;;  %21 = sbr.rel (!%p19_p9) target bundleno = 8 (0x8), region = 93 }
 0x227   :  { %733 = vsyncpa [#allocation3], 1 }
 0x228   :  { %735 = vsyncpa [#allocation3 + $0x1], 1 }
 0x229   :  { %736 = vsyncpa [#allocation6], 1 }
 0x22a   :  { %737 = vsyncpa [#allocation4], 1 }
 0x22b   :  { %739 = vsyncpa [#allocation4 + $0x1], 1 }

// kernel: tpu_custom_call.1
= control target key start
LH: loop header
LB: loop body
LE: loop exit
PB: predicated region body
PF: predicated region fallthrough
CT: control target
= control target key end

     0   :  { %s1502_s0 = inlined_call_operand.hbm [shape: f32[500,128], index: 0, kind: input, shape index: {}]   ;;  %s1503_s1 = inlined_call_operand.hbm [shape: f32[128,128], index: 1, kind: input, shape index: {}]   ;;  %s1504_s2 = inlined_call_operand.vmem [shape: f32[1,128], index: 2, kind: input, shape index: {}]   ;;  %s1505_s3 = inlined_call_operand.hbm [shape: f32[128,128], index: 3, kind: input, shape index: {}]   ;;  %s1506_s4 = inlined_call_operand.vmem [shape: f32[1,128], index: 4, kind: input, shape index: {}]   ;;  %s1507_s5 = inlined_call_operand.hbm [shape: f32[500,128], index: 5, kind: output, shape index: {}]  }
   0x1   :  { %1511 = sst [smem:[#allocation12_spill]] %s1503_s1 }
   0x2   :  { %10 = vsyncpa [#allocation3], 0 }
   0x3   :  { %12 = vsyncpa [#allocation3 + $0x1], 0 }
   0x4   :  { %13 = vsyncpa [#allocation6], 0 }
   0x5   :  { %14 = vsyncpa [#allocation4], 0 }
   0x6   :  { %16 = vsyncpa [#allocation4 + $0x1], 0  ;;  %s1154_s18 = smov 0   ;;  %s1156_s19 = smov 0  }
   0x7   :  { %s1158_s20 = smov 0   ;;  %s1160_s21 = smov 0  }
   0x8 LB: > { %s1175_s22 = sadd.s32 4294967295, %s1112_s21   ;;  %s804_s23 = sadd.s32 4294967294, %s1112_s21   ;;  %s1112_s21 = sphi %s1160_s21, %s1528_s21   ;;  %s1108_s20 = sphi %s1158_s20, %s1527_s20   ;;  %s1104_s19 = sphi %s1156_s19, %s1526_s19   ;;  %s1100_s18 = sphi %s1154_s18, %s1525_s18  }
   0x9   : > { %s1179_s24 = sadd.s32 1, %s1112_s21   ;;  %s29_s25 = sadd.s32 1, %s1108_s20 }
   0xa   : > { %s26_s26 = ssub.s32 %s1112_s21, %s1179_s24  ;;  %p36_p0 = scmp.ne.s32.totalorder %s1108_s20, %s1104_s19 }
   0xb   : > { %p27_p1 = scmp.eq.s32.totalorder %s26_s26, 0  ;;  %p37_p2 = scmp.eq.s32.totalorder %s1112_s21, 0 }
   0xc   : > { %p42_p3 = scmp.ne.s32.totalorder %s1104_s19, %s1100_s18  ;;  %p1510_p4 = scmp.eq.s32.totalorder %s1175_s22, 0 }
   0xd   : > { %s1191_s27 = scalar_select %p27_p1, %s1108_s20, %s29_s25  }
   0xe   : > { %p1193_p5 = por %p37_p2, %p36_p0  ;;  %p1199_p6 = por %p1510_p4, %p42_p3 }
   0xf   : > { %p150_p7 = scmp.eq.s32.totalorder %s1175_s22, 1  ;;  %p156_p8 = scmp.eq.s32.totalorder %s804_s23, 1 }
  0x10   : > { %p805_p9 = scmp.ge.s32.totalorder %s1112_s21, 1  ;;  %p163_p10 = scmp.lt.s32.totalorder %s1112_s21, 3 }
  0x11   : > { %p1206_p11 = por %p150_p7, %p36_p0  ;;  %p1210_p12 = por %p156_p8, %p42_p3 }
  0x12   : > { %p1214_p13 = pnand %p805_p9, %p163_p10  ;;  %s1517_s1 = sld [smem:[#allocation12_spill]] }
  0x13   : > { %s1515_s6 = scalar_select %p1210_p12, 1, 0 }
  0x14   : > { %p874_p1 = pneg %p1214_p13  ;;  %s1114_s11 = smov [#allocation5]  }
  0x15   : > { %s176_s12 = sshll.u32 %s1114_s11, 4  ;;  %s191_s15 = sshll.u32 %s1505_s3, 4  ;;  %s177_s12 = int_to_ptr.vmem [resolvable:$true] %s176_s12  ;;  %s192_s15 = int_to_ptr.hbm [resolvable:$true] %s191_s15 }
  0x16   : > { %p875_p0 = pnand %p874_p1, %p1510_p4  ;;  %s1115_s16 = smov 128  }
  0x17   : > { %s1116_s17 = smov 8   ;;  %s1117_s23 = smov [#allocation7]  }
  0x18   : > { %s174_s10 = sshll.u32 %s1517_s1, 4  ;;  %s193_s25 = sshll.u32 %s1117_s23, 4  ;;  %s175_s10 = int_to_ptr.hbm [resolvable:$true] %s174_s10  ;;  %s194_s25 = int_to_ptr.vmem [resolvable:$true] %s193_s25 }
  0x19   : > { %877 = dma.hbm_to_vmem [thread:$0]  (!%p875_p0), %s175_s10, 2048, %s177_s12, [#allocation6], %s1115_s16, %s1115_s16, %s1116_s17  }
  0x1a   : > { %880 = dma.hbm_to_vmem [thread:$0]  (!%p875_p0), %s192_s15, 2048, %s194_s25, [#allocation6], %s1115_s16, %s1115_s16, %s1116_s17  }
  0x1b   : > { %p1509_p2 = scmp.ge.s32.totalorder %s1112_s21, 2 }
  0x1d   : > { %206 = sbr.rel (%p1509_p2) target bundleno = 71 (0x47), region = 32 }
  0x22   : > { %209 = sbr.rel (!%p1193_p5) target bundleno = 71 (0x47), region = 36  ;;  %s210_s26 = sand.u32 (%p1193_p5), 1, %s1108_s20  }
  0x23   : > { %s810_s8 = sshll.u32 (%p1193_p5), %s1112_s21, 5  ;;  %s809_s9 = sshll.u32 (%p1193_p5), %s210_s26, 8 }
  0x24   : > { %s216_s11 = ssub.s32 (%p1193_p5), 63, %s810_s8  ;;  %s1238_s14 = scalar_lea.sflag (%p1193_p5), [#allocation3], %s210_s26 }
  0x25   : > { %p217_p3 = scmp.lt.s32.totalorder (%p1193_p5), %s216_s11, 32  ;;  %s214_s15 = scalar_lea.vmem (%p1193_p5), [#allocation2], %s809_s9 }
  0x27   : > { %s1530_s11 = smov (!%p217_p3, %s216_s11), 32 }
  0x28   : > { %s811_s10 = sshll.u32 %s1530_s11, 3 }
  0x29   : > { %s220_s12 = ssub.s32 256, %s811_s10 }
  0x2a   : > { %s221_s13 = sshll.u32 %s220_s12, 4 }
  0x2b   : > { %222 = vsyncadd %s1238_s14, %s221_s13  ;;  %p1241_p5 = scmp.ne.s32.totalorder %s811_s10, 0  ;;  %s830_s16 = sshll.u32 %s1112_s21, 8 }
  0x2c   : > { %s225_s25 = scalar_lea.hbm %s1502_s0, %s830_s16  ;;  %s1249_s8 = sshll.u32 %s214_s15, 4  ;;  %s230_s8 = int_to_ptr.vmem [resolvable:$true] %s1249_s8 }
  0x2d   : > { %s227_s26 = sshll.u32 %s225_s25, 4  ;;  %s1508_s9 = sshll.u32 %s1530_s11, 7  ;;  %s1252_s26 = int_to_ptr.hbm [resolvable:$true] %s227_s26 }
  0x2e   : > { %s992_s12 = sshra.s32 %s1252_s26, 4  ;;  %s994_s10 = sshrl.u32 %s1508_s9, 4  ;;  %s993_s12 = int_to_ptr.hbm [resolvable:$true] %s992_s12 }
  0x2f   : > { %s999_s13 = scalar_lea.hbm %s993_s12, %s994_s10  ;;  %s1003_s15 = scalar_lea.hbm %s1502_s0, 504 }
  0x30   : > { %p1000_p7 = scmp.ne.s32.totalorder %s993_s12, %s999_s13  ;;  %p1004_p10 = scmp.lt.s32.totalorder %s993_s12, %s1502_s0 }
  0x31   : > { %p1005_p1 = scmp.lt.s32.totalorder %s1003_s15, %s999_s13 }
  0x32   : > { %p1001_p8 = pnand %p1000_p7, %p1241_p5 }
  0x33   : > { %p1006_p0 = por %p1005_p1, %p1004_p10 }
  0x34   : > { %p1002_p9 = pneg %p1001_p8 }
  0x36   : > { %p1007_p3 = pnand %p1006_p0, %p1002_p9 }
  0x38   : > { %1010 = shalt.err (!%p1007_p3)
}
  0x39   : > { %s1011_s9 = sshra.s32 %s230_s8, 4  ;;  %s1118_s17 = smov [#allocation2]   ;;  %s1012_s9 = int_to_ptr.vmem [resolvable:$true] %s1011_s9 }
  0x3a   : > { %s1018_s1 = scalar_lea.vmem %s1012_s9, %s994_s10  ;;  %s1022_s16 = scalar_lea.vmem %s1118_s17, 512 }
  0x3b   : > { %p1019_p7 = scmp.ne.s32.totalorder %s1012_s9, %s1018_s1  ;;  %p1024_p4 = scmp.lt.s32.totalorder %s1022_s16, %s1018_s1 }
  0x3d   : > { %p1020_p8 = pnand %p1019_p7, %p1241_p5 }
  0x3f   : > { %p1021_p2 = pneg %p1020_p8 }
  0x41   : > { %p1026_p12 = pnand %p1024_p4, %p1021_p2 }
  0x43   : > { %1029 = shalt.err (!%p1026_p12)
}
  0x44   : > { %s1119_s12 = smov 128   ;;  %s1120_s13 = smov 8  }
  0x45   : > { %s1519_s15 = sshll.u32 %s1530_s11, 7 }
  0x46   : > { %235 = dma.hbm_to_vmem [thread:$0]  (%p1241_p5), %s1252_s26, %s1519_s15, %s230_s8, %s1238_s14, %s1119_s12, %s1119_s12, %s1120_s13  }
  0x47 PF: > { %241 = sbr.rel (%p1214_p13) target bundleno = 536 (0x218), region = 40  ;;  %s1281_s1 = sand.u32 (!%p1214_p13), 1, %s1104_s19  }
  0x48   : > { %s817_s9 = sshll.u32 (!%p1214_p13), %s1281_s1, 8  ;;  %s244_s10 = scalar_lea.sflag (!%p1214_p13), [#allocation3], %s1281_s1 }
  0x49   : > { %s1287_s23 = scalar_lea.vmem (!%p1214_p13), [#allocation2], %s817_s9 }
  0x4c   : > { %1087 = dma.done.wait (%p1199_p6), %s244_s10, 4096  }
  0x4d   : > { %1089 = vsyncadd (%p1199_p6), %s244_s10, 4294963200  ;;  %p1520_p4 = scmp.eq.s32.totalorder %s1175_s22, 0 }
  0x4f   : > { %1091 = dma.done.wait (%p1520_p4), [#allocation6], 4096   ;;  %p1521_p12 = pmov %p1520_p4 }
  0x50   : > { %v342_v0 = vld [vmem:[#allocation5 + $0x78] sm:$0xff]  ;;  %v341_v1 = vld [vmem:[#allocation5 + $0x70] sm:$0xff]  ;;  %v340_v2 = vld [vmem:[#allocation5 + $0x68] sm:$0xff]  ;;  %s1374_s28 = scalar_lea.vmem [#allocation8], %s817_s9  ;;  %s690_s8 = scalar_lea.sflag [#allocation4], %s1281_s1 }
  0x51   : > { %1093 = vsyncadd (%p1521_p12), [#allocation6], 4294963200  ;;  %832 = vmatpush.msra.mxu2 %v342_v0  ;;  %347 = vmatpush.msra.mxu0 %v342_v0  ;;  %v339_v3 = vld [vmem:[#allocation5 + $0x60] sm:$0xff]  ;;  %v338_v4 = vld [vmem:[#allocation5 + $0x58] sm:$0xff]  ;;  %s822_s26 = sshll.u32 (%p1206_p11), %s1175_s22, 5 }
  0x52   : > { %v337_v5 = vld [vmem:[#allocation5 + $0x50] sm:$0xff]  ;;  %v336_v6 = vld [vmem:[#allocation5 + $0x48] sm:$0xff]  ;;  %v335_v7 = vld [vmem:[#allocation5 + $0x40] sm:$0xff]  ;;  %s698_s25 = ssub.s32 (%p1206_p11), 63, %s822_s26 }
  0x53   : > { %833 = vmatpush.msra.mxu2 %v341_v1  ;;  %348 = vmatpush.msra.mxu0 %v341_v1  ;;  %v334_v8 = vld [vmem:[#allocation5 + $0x38] sm:$0xff]  ;;  %v333_v9 = vld [vmem:[#allocation5 + $0x30] sm:$0xff]  ;;  %v332_v10 = vld [vmem:[#allocation5 + $0x28] sm:$0xff]  ;;  %p699_p6 = scmp.lt.s32.totalorder (%p1206_p11), %s698_s25, 32 }
  0x54   : > { %v331_v11 = vld [vmem:[#allocation5 + $0x20] sm:$0xff]  ;;  %v330_v12 = vld [vmem:[#allocation5 + $0x18] sm:$0xff]  ;;  %v329_v13 = vld [vmem:[#allocation5 + $0x10] sm:$0xff] }
  0x55   : > { %834 = vmatpush.msra.mxu2 %v340_v2  ;;  %349 = vmatpush.msra.mxu0 %v340_v2  ;;  %v328_v14 = vld [vmem:[#allocation5 + $0x8] sm:$0xff]  ;;  %v327_v15 = vld [vmem:[#allocation5] sm:$0xff]  ;;  %v313_v20 = vld [vmem:[%s1287_s23 + $0x90] sm:$0xff] }
  0x56   : > { %v311_v16 = vld [vmem:[%s1287_s23 + $0x80] sm:$0xff]  ;;  %v312_v18 = vld [vmem:[%s1287_s23 + $0x88] sm:$0xff]  ;;  %v297_v21 = vld [vmem:[%s1287_s23 + $0x10] sm:$0xff] }
  0x57   : > { %835 = vmatpush.msra.mxu2 %v339_v3  ;;  %350 = vmatpush.msra.mxu0 %v339_v3  ;;  %v295_v17 = vld [vmem:[%s1287_s23] sm:$0xff]  ;;  %v296_v19 = vld [vmem:[%s1287_s23 + $0x8] sm:$0xff]  ;;  %v314_v22 = vld [vmem:[%s1287_s23 + $0x98] sm:$0xff] }
  0x58   : > { %v298_v23 = vld [vmem:[%s1287_s23 + $0x18] sm:$0xff]  ;;  %v315_v24 = vld [vmem:[%s1287_s23 + $0xa0] sm:$0xff]  ;;  %v316_v26 = vld [vmem:[%s1287_s23 + $0xa8] sm:$0xff] }
  0x59   : > { %836 = vmatpush.msra.mxu2 %v338_v4  ;;  %351 = vmatpush.msra.mxu0 %v338_v4  ;;  %v299_v25 = vld [vmem:[%s1287_s23 + $0x20] sm:$0xff]  ;;  %v300_v27 = vld [vmem:[%s1287_s23 + $0x28] sm:$0xff]  ;;  %v317_v28 = vld [vmem:[%s1287_s23 + $0xb0] sm:$0xff] }
  0x5a   : > { %v301_v29 = vld [vmem:[%s1287_s23 + $0x30] sm:$0xff]  ;;  %v318_v30 = vld [vmem:[%s1287_s23 + $0xb8] sm:$0xff]  ;;  %v319_v32 = vld [vmem:[%s1287_s23 + $0xc0] sm:$0xff] }
  0x5b   : > { %837 = vmatpush.msra.mxu2 %v337_v5  ;;  %352 = vmatpush.msra.mxu0 %v337_v5  ;;  %v302_v31 = vld [vmem:[%s1287_s23 + $0x38] sm:$0xff]  ;;  %v303_v33 = vld [vmem:[%s1287_s23 + $0x40] sm:$0xff]  ;;  %v320_v34 = vld [vmem:[%s1287_s23 + $0xc8] sm:$0xff] }
  0x5c   : > { %v304_v35 = vld [vmem:[%s1287_s23 + $0x48] sm:$0xff]  ;;  %v507_v36 = vld [vmem:[#allocation7 + $0x78] sm:$0xff]  ;;  %v506_v37 = vld [vmem:[#allocation7 + $0x70] sm:$0xff] }
  0x5d   : > { %838 = vmatpush.msra.mxu2 %v336_v6  ;;  %353 = vmatpush.msra.mxu0 %v336_v6  ;;  %v505_v38 = vld [vmem:[#allocation7 + $0x68] sm:$0xff]  ;;  %v504_v39 = vld [vmem:[#allocation7 + $0x60] sm:$0xff]  ;;  %v321_v40 = vld [vmem:[%s1287_s23 + $0xd0] sm:$0xff] }
  0x5e   : > { %848 = vmatpush.msra.mxu3 %v507_v36  ;;  %512 = vmatpush.msra.mxu1 %v507_v36  ;;  %v305_v41 = vld [vmem:[%s1287_s23 + $0x50] sm:$0xff]  ;;  %v503_v42 = vld [vmem:[#allocation7 + $0x58] sm:$0xff]  ;;  %v501_v44 = vld [vmem:[#allocation7 + $0x48] sm:$0xff] }
  0x5f   : > { %839 = vmatpush.msra.mxu2 %v335_v7  ;;  %354 = vmatpush.msra.mxu0 %v335_v7  ;;  %v502_v43 = vld [vmem:[#allocation7 + $0x50] sm:$0xff]  ;;  %v500_v45 = vld [vmem:[#allocation7 + $0x40] sm:$0xff]  ;;  %v322_v46 = vld [vmem:[%s1287_s23 + $0xd8] sm:$0xff] }
  0x60   : > { %849 = vmatpush.msra.mxu3 %v506_v37  ;;  %513 = vmatpush.msra.mxu1 %v506_v37  ;;  %v306_v47 = vld [vmem:[%s1287_s23 + $0x58] sm:$0xff]  ;;  %v498_v49 = vld [vmem:[#allocation7 + $0x30] sm:$0xff]  ;;  %v497_v50 = vld [vmem:[#allocation7 + $0x28] sm:$0xff] }
  0x61   : > { %840 = vmatpush.msra.mxu2 %v334_v8  ;;  %355 = vmatpush.msra.mxu0 %v334_v8  ;;  %v499_v48 = vld [vmem:[#allocation7 + $0x38] sm:$0xff]  ;;  %v496_v51 = vld [vmem:[#allocation7 + $0x20] sm:$0xff]  ;;  %v494_v55 = vld [vmem:[#allocation7 + $0x10] sm:$0xff] }
  0x62   : > { %850 = vmatpush.msra.mxu3 %v505_v38  ;;  %514 = vmatpush.msra.mxu1 %v505_v38  ;;  %v323_v52 = vld [vmem:[%s1287_s23 + $0xe0] sm:$0xff]  ;;  %v495_v54 = vld [vmem:[#allocation7 + $0x18] sm:$0xff]  ;;  %v493_v56 = vld [vmem:[#allocation7 + $0x8] sm:$0xff] }
  0x63   : > { %841 = vmatpush.msra.mxu2 %v333_v9  ;;  %356 = vmatpush.msra.mxu0 %v333_v9  ;;  %v307_v53 = vld [vmem:[%s1287_s23 + $0x60] sm:$0xff]  ;;  %v324_v57 = vld [vmem:[%s1287_s23 + $0xe8] sm:$0xff]  ;;  %v325_v60 = vld [vmem:[%s1287_s23 + $0xf0] sm:$0xff] }
  0x64   : > { %851 = vmatpush.msra.mxu3 %v504_v39  ;;  %515 = vmatpush.msra.mxu1 %v504_v39  ;;  %v308_v58 = vld [vmem:[%s1287_s23 + $0x68] sm:$0xff]  ;;  %v492_v59 = vld [vmem:[#allocation7] sm:$0xff]  ;;  %v309_v61 = vld [vmem:[%s1287_s23 + $0x70] sm:$0xff] }
  0x65   : > { %842 = vmatpush.msra.mxu2 %v332_v10  ;;  %357 = vmatpush.msra.mxu0 %v332_v10  ;;  %v326_v62 = vld [vmem:[%s1287_s23 + $0xf8] sm:$0xff]  ;;  %v1332_v0 = vld [vmem:[%s1504_s2] ss:$0 sm:$0xff] }
  0x66   : > { %852 = vmatpush.msra.mxu3 %v503_v42  ;;  %516 = vmatpush.msra.mxu1 %v503_v42  ;;  %v310_v63 = vld [vmem:[%s1287_s23 + $0x78] sm:$0xff] }
  0x67   : > { %843 = vmatpush.msra.mxu2 %v331_v11  ;;  %358 = vmatpush.msra.mxu0 %v331_v11 }
  0x68   : > { %853 = vmatpush.msra.mxu3 %v502_v43  ;;  %517 = vmatpush.msra.mxu1 %v502_v43 }
  0x69   : > { %844 = vmatpush.msra.mxu2 %v330_v12  ;;  %359 = vmatpush.msra.mxu0 %v330_v12 }
  0x6a   : > { %854 = vmatpush.msra.mxu3 %v501_v44  ;;  %518 = vmatpush.msra.mxu1 %v501_v44 }
  0x6b   : > { %845 = vmatpush.msra.mxu2 %v329_v13  ;;  %360 = vmatpush.msra.mxu0 %v329_v13 }
  0x6c   : > { %855 = vmatpush.msra.mxu3 %v500_v45  ;;  %519 = vmatpush.msra.mxu1 %v500_v45 }
  0x6d   : > { %846 = vmatpush.msra.mxu2 %v328_v14  ;;  %361 = vmatpush.msra.mxu0 %v328_v14 }
  0x6e   : > { %856 = vmatpush.msra.mxu3 %v499_v48  ;;  %520 = vmatpush.msra.mxu1 %v499_v48 }
  0x6f   : > { %847 = vmatpush.msra.mxu2 %v327_v15  ;;  %362 = vmatpush.msra.mxu0 %v327_v15 }
  0x70   : > { %411 = vmatmul.f32.vlgmr.msra.gmra.mxu2 %v311_v16  ;;  %363 = vmatmul.f32.vlgmr.msra.gmra.mxu0 %v295_v17 }
  0x71   : > { %857 = vmatpush.msra.mxu3 %v498_v49  ;;  %521 = vmatpush.msra.mxu1 %v498_v49 }
  0x73   : > { %858 = vmatpush.msra.mxu3 %v497_v50  ;;  %522 = vmatpush.msra.mxu1 %v497_v50 }
  0x75   : > { %859 = vmatpush.msra.mxu3 %v496_v51  ;;  %523 = vmatpush.msra.mxu1 %v496_v51 }
  0x77   : > { %860 = vmatpush.msra.mxu3 %v495_v54  ;;  %524 = vmatpush.msra.mxu1 %v495_v54 }
  0x78   : > { %414 = vmatmul.f32.gmra.mxu2 %v312_v18  ;;  %366 = vmatmul.f32.gmra.mxu0 %v296_v19 }
  0x79   : > { %861 = vmatpush.msra.mxu3 %v494_v55  ;;  %525 = vmatpush.msra.mxu1 %v494_v55 }
  0x7b   : > { %862 = vmatpush.msra.mxu3 %v493_v56  ;;  %526 = vmatpush.msra.mxu1 %v493_v56 }
  0x7d   : > { %863 = vmatpush.msra.mxu3 %v492_v59  ;;  %527 = vmatpush.msra.mxu1 %v492_v59 }
  0x80   : > { %417 = vmatmul.f32.gmra.mxu2 %v313_v20  ;;  %369 = vmatmul.f32.gmra.mxu0 %v297_v21 }
  0x88   : > { %420 = vmatmul.f32.gmra.mxu2 %v314_v22  ;;  %372 = vmatmul.f32.gmra.mxu0 %v298_v23 }
  0x90   : > { %423 = vmatmul.f32.gmra.mxu2 %v315_v24  ;;  %375 = vmatmul.f32.gmra.mxu0 %v299_v25 }
  0x98   : > { %426 = vmatmul.f32.gmra.mxu2 %v316_v26  ;;  %378 = vmatmul.f32.gmra.mxu0 %v300_v27 }
  0xa0   : > { %429 = vmatmul.f32.gmra.mxu2 %v317_v28  ;;  %381 = vmatmul.f32.gmra.mxu0 %v301_v29 }
  0xa8   : > { %432 = vmatmul.f32.gmra.mxu2 %v318_v30  ;;  %384 = vmatmul.f32.gmra.mxu0 %v302_v31 }
  0xb0   : > { %435 = vmatmul.f32.gmra.mxu2 %v319_v32  ;;  %387 = vmatmul.f32.gmra.mxu0 %v303_v33 }
  0xb8   : > { %438 = vmatmul.f32.gmra.mxu2 %v320_v34  ;;  %390 = vmatmul.f32.gmra.mxu0 %v304_v35 }
  0xc0   : > { %441 = vmatmul.f32.gmra.mxu2 %v321_v40  ;;  %393 = vmatmul.f32.gmra.mxu0 %v305_v41 }
  0xc8   : > { %444 = vmatmul.f32.gmra.mxu2 %v322_v46  ;;  %396 = vmatmul.f32.gmra.mxu0 %v306_v47 }
  0xd0   : > { %447 = vmatmul.f32.gmra.mxu2 %v323_v52  ;;  %399 = vmatmul.f32.gmra.mxu0 %v307_v53 }
  0xd8   : > { %450 = vmatmul.f32.gmra.mxu2 %v324_v57  ;;  %402 = vmatmul.f32.gmra.mxu0 %v308_v58 }
  0xe0   : > { %453 = vmatmul.f32.gmra.mxu2 %v325_v60  ;;  %405 = vmatmul.f32.gmra.mxu0 %v309_v61 }
  0xe8   : > { %456 = vmatmul.f32.gmra.mxu2 %v326_v62  ;;  %408 = vmatmul.f32.gmra.mxu0 %v310_v63 }
  0xed   : > { %v364_v1 = vpop.f32.mrf.mxu0 }
  0xee   : > { %v365_v2 = vadd.f32 %v1332_v0, %v364_v1 }
  0xf0   : > { %v460_v3 = vmax.f32 %v365_v2, 0.0 }
  0xf2   : > { %528 = vmatmul.f32.vlgmr.msra.gmra.mxu1 %v460_v3 }
  0xf3   : > { %v412_v4 = vpop.f32.mrf.mxu2 }
  0xf4   : > { %v413_v5 = vadd.f32 %v1332_v0, %v412_v4 }
  0xf5   : > { %v367_v6 = vpop.f32.mrf.mxu0 }
  0xf6   : > { %v476_v7 = vmax.f32 %v413_v5, 0.0  ;;  %v368_v8 = vadd.f32 %v1332_v0, %v367_v6 }
  0xf8   : > { %576 = vmatmul.f32.vlgmr.msra.gmra.mxu3 %v476_v7  ;;  %v461_v9 = vmax.f32 %v368_v8, 0.0 }
  0xfa   : > { %531 = vmatmul.f32.gmra.mxu1 %v461_v9 }
  0xfb   : > { %v415_v10 = vpop.f32.mrf.mxu2 }
  0xfc   : > { %v416_v11 = vadd.f32 %v1332_v0, %v415_v10 }
  0xfd   : > { %v370_v12 = vpop.f32.mrf.mxu0 }
  0xfe   : > { %v477_v13 = vmax.f32 %v416_v11, 0.0  ;;  %v371_v14 = vadd.f32 %v1332_v0, %v370_v12 }
 0x100   : > { %579 = vmatmul.f32.gmra.mxu3 %v477_v13  ;;  %v462_v15 = vmax.f32 %v371_v14, 0.0 }
 0x102   : > { %534 = vmatmul.f32.gmra.mxu1 %v462_v15 }
 0x103   : > { %v418_v16 = vpop.f32.mrf.mxu2 }
 0x104   : > { %v419_v17 = vadd.f32 %v1332_v0, %v418_v16 }
 0x105   : > { %v373_v18 = vpop.f32.mrf.mxu0 }
 0x106   : > { %v478_v19 = vmax.f32 %v419_v17, 0.0  ;;  %v374_v20 = vadd.f32 %v1332_v0, %v373_v18 }
 0x108   : > { %582 = vmatmul.f32.gmra.mxu3 %v478_v19  ;;  %v463_v21 = vmax.f32 %v374_v20, 0.0 }
 0x10a   : > { %537 = vmatmul.f32.gmra.mxu1 %v463_v21 }
 0x10b   : > { %v421_v22 = vpop.f32.mrf.mxu2 }
 0x10c   : > { %v422_v23 = vadd.f32 %v1332_v0, %v421_v22 }
 0x10d   : > { %v376_v24 = vpop.f32.mrf.mxu0 }
 0x10e   : > { %v479_v25 = vmax.f32 %v422_v23, 0.0  ;;  %v377_v26 = vadd.f32 %v1332_v0, %v376_v24 }
 0x110   : > { %585 = vmatmul.f32.gmra.mxu3 %v479_v25  ;;  %v464_v27 = vmax.f32 %v377_v26, 0.0 }
 0x112   : > { %540 = vmatmul.f32.gmra.mxu1 %v464_v27 }
 0x113   : > { %v424_v28 = vpop.f32.mrf.mxu2 }
 0x114   : > { %v425_v29 = vadd.f32 %v1332_v0, %v424_v28 }
 0x115   : > { %v379_v30 = vpop.f32.mrf.mxu0 }
 0x116   : > { %v480_v31 = vmax.f32 %v425_v29, 0.0  ;;  %v380_v32 = vadd.f32 %v1332_v0, %v379_v30 }
 0x118   : > { %588 = vmatmul.f32.gmra.mxu3 %v480_v31  ;;  %v465_v33 = vmax.f32 %v380_v32, 0.0 }
 0x11a   : > { %543 = vmatmul.f32.gmra.mxu1 %v465_v33  ;;  %v1369_v33 = vld [vmem:[%s1506_s4] ss:$0 sm:$0xff] }
 0x11b   : > { %v427_v34 = vpop.f32.mrf.mxu2 }
 0x11c   : > { %v428_v35 = vadd.f32 %v1332_v0, %v427_v34 }
 0x11d   : > { %v382_v36 = vpop.f32.mrf.mxu0 }
 0x11e   : > { %v481_v37 = vmax.f32 %v428_v35, 0.0  ;;  %v383_v38 = vadd.f32 %v1332_v0, %v382_v36 }
 0x120   : > { %591 = vmatmul.f32.gmra.mxu3 %v481_v37  ;;  %v466_v39 = vmax.f32 %v383_v38, 0.0 }
 0x122   : > { %546 = vmatmul.f32.gmra.mxu1 %v466_v39 }
 0x123   : > { %v430_v40 = vpop.f32.mrf.mxu2 }
 0x124   : > { %v431_v41 = vadd.f32 %v1332_v0, %v430_v40 }
 0x125   : > { %v385_v42 = vpop.f32.mrf.mxu0 }
 0x126   : > { %v482_v43 = vmax.f32 %v431_v41, 0.0  ;;  %v386_v44 = vadd.f32 %v1332_v0, %v385_v42 }
 0x128   : > { %594 = vmatmul.f32.gmra.mxu3 %v482_v43  ;;  %v467_v45 = vmax.f32 %v386_v44, 0.0 }
 0x12a   : > { %549 = vmatmul.f32.gmra.mxu1 %v467_v45 }
 0x12b   : > { %v433_v46 = vpop.f32.mrf.mxu2 }
 0x12c   : > { %v434_v47 = vadd.f32 %v1332_v0, %v433_v46 }
 0x12d   : > { %v388_v48 = vpop.f32.mrf.mxu0 }
 0x12e   : > { %v483_v49 = vmax.f32 %v434_v47, 0.0  ;;  %v389_v50 = vadd.f32 %v1332_v0, %v388_v48 }
 0x130   : > { %597 = vmatmul.f32.gmra.mxu3 %v483_v49  ;;  %v468_v51 = vmax.f32 %v389_v50, 0.0 }
 0x132   : > { %552 = vmatmul.f32.gmra.mxu1 %v468_v51 }
 0x133   : > { %v436_v52 = vpop.f32.mrf.mxu2 }
 0x134   : > { %v437_v53 = vadd.f32 %v1332_v0, %v436_v52 }
 0x135   : > { %v391_v54 = vpop.f32.mrf.mxu0 }
 0x136   : > { %v484_v55 = vmax.f32 %v437_v53, 0.0  ;;  %v392_v56 = vadd.f32 %v1332_v0, %v391_v54 }
 0x138   : > { %600 = vmatmul.f32.gmra.mxu3 %v484_v55  ;;  %v469_v57 = vmax.f32 %v392_v56, 0.0 }
 0x13a   : > { %555 = vmatmul.f32.gmra.mxu1 %v469_v57 }
 0x13b   : > { %v439_v58 = vpop.f32.mrf.mxu2 }
 0x13c   : > { %v440_v59 = vadd.f32 %v1332_v0, %v439_v58 }
 0x13d   : > { %v394_v60 = vpop.f32.mrf.mxu0 }
 0x13e   : > { %v485_v61 = vmax.f32 %v440_v59, 0.0  ;;  %v395_v62 = vadd.f32 %v1332_v0, %v394_v60 }
 0x140   : > { %603 = vmatmul.f32.gmra.mxu3 %v485_v61  ;;  %v470_v63 = vmax.f32 %v395_v62, 0.0 }
 0x142   : > { %558 = vmatmul.f32.gmra.mxu1 %v470_v63 }
 0x143   : > { %v442_v1 = vpop.f32.mrf.mxu2 }
 0x144   : > { %v443_v2 = vadd.f32 %v1332_v0, %v442_v1 }
 0x145   : > { %v397_v3 = vpop.f32.mrf.mxu0 }
 0x146   : > { %v486_v4 = vmax.f32 %v443_v2, 0.0  ;;  %v398_v5 = vadd.f32 %v1332_v0, %v397_v3 }
 0x148   : > { %606 = vmatmul.f32.gmra.mxu3 %v486_v4  ;;  %v471_v6 = vmax.f32 %v398_v5, 0.0 }
 0x14a   : > { %561 = vmatmul.f32.gmra.mxu1 %v471_v6 }
 0x14b   : > { %v445_v7 = vpop.f32.mrf.mxu2 }
 0x14c   : > { %v446_v8 = vadd.f32 %v1332_v0, %v445_v7 }
 0x14d   : > { %v400_v9 = vpop.f32.mrf.mxu0 }
 0x14e   : > { %v487_v10 = vmax.f32 %v446_v8, 0.0  ;;  %v401_v11 = vadd.f32 %v1332_v0, %v400_v9 }
 0x150   : > { %609 = vmatmul.f32.gmra.mxu3 %v487_v10  ;;  %v472_v12 = vmax.f32 %v401_v11, 0.0 }
 0x152   : > { %564 = vmatmul.f32.gmra.mxu1 %v472_v12 }
 0x153   : > { %v448_v13 = vpop.f32.mrf.mxu2 }
 0x154   : > { %v449_v14 = vadd.f32 %v1332_v0, %v448_v13 }
 0x155   : > { %v403_v15 = vpop.f32.mrf.mxu0 }
 0x156   : > { %v488_v16 = vmax.f32 %v449_v14, 0.0  ;;  %v404_v17 = vadd.f32 %v1332_v0, %v403_v15 }
 0x158   : > { %612 = vmatmul.f32.gmra.mxu3 %v488_v16  ;;  %v473_v18 = vmax.f32 %v404_v17, 0.0 }
 0x15a   : > { %567 = vmatmul.f32.gmra.mxu1 %v473_v18 }
 0x15b   : > { %v451_v19 = vpop.f32.mrf.mxu2 }
 0x15c   : > { %v452_v20 = vadd.f32 %v1332_v0, %v451_v19 }
 0x15d   : > { %v406_v21 = vpop.f32.mrf.mxu0 }
 0x15e   : > { %v489_v22 = vmax.f32 %v452_v20, 0.0  ;;  %v407_v23 = vadd.f32 %v1332_v0, %v406_v21 }
 0x160   : > { %615 = vmatmul.f32.gmra.mxu3 %v489_v22  ;;  %v474_v24 = vmax.f32 %v407_v23, 0.0 }
 0x162   : > { %570 = vmatmul.f32.gmra.mxu1 %v474_v24 }
 0x163   : > { %v454_v25 = vpop.f32.mrf.mxu2 }
 0x164   : > { %v455_v26 = vadd.f32 %v1332_v0, %v454_v25 }
 0x165   : > { %v409_v27 = vpop.f32.mrf.mxu0 }
 0x166   : > { %v490_v28 = vmax.f32 %v455_v26, 0.0  ;;  %v410_v29 = vadd.f32 %v1332_v0, %v409_v27 }
 0x168   : > { %618 = vmatmul.f32.gmra.mxu3 %v490_v28  ;;  %v475_v30 = vmax.f32 %v410_v29, 0.0 }
 0x16a   : > { %573 = vmatmul.f32.gmra.mxu1 %v475_v30 }
 0x16b   : > { %v457_v31 = vpop.f32.mrf.mxu2 }
 0x16c   : > { %v458_v32 = vadd.f32 %v1332_v0, %v457_v31 }
 0x16e   : > { %v491_v34 = vmax.f32 %v458_v32, 0.0 }
 0x16f   : > { %v529_v35 = vpop.f32.mrf.mxu1 }
 0x170   : > { %621 = vmatmul.f32.gmra.mxu3 %v491_v34  ;;  %v530_v36 = vadd.f32 %v1369_v33, %v529_v35 }
 0x172   : > { %v625_v37 = vmax.f32 %v530_v36, 0.0 }
 0x174   : > { %657 = vst [vmem:[%s1374_s28] sm:$0xff] %v625_v37 }
 0x177   : > { %v532_v0 = vpop.f32.mrf.mxu1 }
 0x178   : > { %v533_v38 = vadd.f32 %v1369_v33, %v532_v0 }
 0x17a   : > { %v626_v39 = vmax.f32 %v533_v38, 0.0 }
 0x17b   : > { %v577_v40 = vpop.f32.mrf.mxu3 }
 0x17c   : > { %v578_v41 = vadd.f32 %v1369_v33, %v577_v40  ;;  %658 = vst [vmem:[%s1374_s28 + $0x8] sm:$0xff] %v626_v39 }
 0x17e   : > { %v641_v42 = vmax.f32 %v578_v41, 0.0 }
 0x17f   : > { %v535_v43 = vpop.f32.mrf.mxu1 }
 0x180   : > { %673 = vst [vmem:[%s1374_s28 + $0x80] sm:$0xff] %v641_v42  ;;  %v536_v44 = vadd.f32 %v1369_v33, %v535_v43 }
 0x182   : > { %v627_v45 = vmax.f32 %v536_v44, 0.0 }
 0x183   : > { %v580_v46 = vpop.f32.mrf.mxu3 }
 0x184   : > { %v581_v47 = vadd.f32 %v1369_v33, %v580_v46  ;;  %659 = vst [vmem:[%s1374_s28 + $0x10] sm:$0xff] %v627_v45 }
 0x186   : > { %v642_v48 = vmax.f32 %v581_v47, 0.0 }
 0x187   : > { %v538_v49 = vpop.f32.mrf.mxu1 }
 0x188   : > { %674 = vst [vmem:[%s1374_s28 + $0x88] sm:$0xff] %v642_v48  ;;  %v539_v50 = vadd.f32 %v1369_v33, %v538_v49 }
 0x18a   : > { %v628_v51 = vmax.f32 %v539_v50, 0.0 }
 0x18b   : > { %v583_v52 = vpop.f32.mrf.mxu3 }
 0x18c   : > { %v584_v53 = vadd.f32 %v1369_v33, %v583_v52  ;;  %660 = vst [vmem:[%s1374_s28 + $0x18] sm:$0xff] %v628_v51 }
 0x18e   : > { %v643_v54 = vmax.f32 %v584_v53, 0.0 }
 0x18f   : > { %v541_v55 = vpop.f32.mrf.mxu1 }
 0x190   : > { %675 = vst [vmem:[%s1374_s28 + $0x90] sm:$0xff] %v643_v54  ;;  %v542_v56 = vadd.f32 %v1369_v33, %v541_v55 }
 0x192   : > { %v629_v57 = vmax.f32 %v542_v56, 0.0 }
 0x193   : > { %v586_v58 = vpop.f32.mrf.mxu3 }
 0x194   : > { %v587_v59 = vadd.f32 %v1369_v33, %v586_v58  ;;  %661 = vst [vmem:[%s1374_s28 + $0x20] sm:$0xff] %v629_v57 }
 0x196   : > { %v644_v60 = vmax.f32 %v587_v59, 0.0 }
 0x197   : > { %v544_v61 = vpop.f32.mrf.mxu1 }
 0x198   : > { %676 = vst [vmem:[%s1374_s28 + $0x98] sm:$0xff] %v644_v60  ;;  %v545_v62 = vadd.f32 %v1369_v33, %v544_v61 }
 0x19a   : > { %v630_v63 = vmax.f32 %v545_v62, 0.0 }
 0x19b   : > { %v589_v1 = vpop.f32.mrf.mxu3 }
 0x19c   : > { %v590_v2 = vadd.f32 %v1369_v33, %v589_v1  ;;  %662 = vst [vmem:[%s1374_s28 + $0x28] sm:$0xff] %v630_v63 }
 0x19e   : > { %v645_v3 = vmax.f32 %v590_v2, 0.0 }
 0x19f   : > { %v547_v4 = vpop.f32.mrf.mxu1 }
 0x1a0   : > { %677 = vst [vmem:[%s1374_s28 + $0xa0] sm:$0xff] %v645_v3  ;;  %v548_v5 = vadd.f32 %v1369_v33, %v547_v4 }
 0x1a2   : > { %v631_v6 = vmax.f32 %v548_v5, 0.0 }
 0x1a3   : > { %v592_v7 = vpop.f32.mrf.mxu3 }
 0x1a4   : > { %v593_v8 = vadd.f32 %v1369_v33, %v592_v7  ;;  %663 = vst [vmem:[%s1374_s28 + $0x30] sm:$0xff] %v631_v6 }
 0x1a6   : > { %v646_v9 = vmax.f32 %v593_v8, 0.0 }
 0x1a7   : > { %v550_v10 = vpop.f32.mrf.mxu1 }
 0x1a8   : > { %678 = vst [vmem:[%s1374_s28 + $0xa8] sm:$0xff] %v646_v9  ;;  %v551_v11 = vadd.f32 %v1369_v33, %v550_v10 }
 0x1aa   : > { %v632_v12 = vmax.f32 %v551_v11, 0.0 }
 0x1ab   : > { %v595_v13 = vpop.f32.mrf.mxu3 }
 0x1ac   : > { %v596_v14 = vadd.f32 %v1369_v33, %v595_v13  ;;  %664 = vst [vmem:[%s1374_s28 + $0x38] sm:$0xff] %v632_v12 }
 0x1ae   : > { %v647_v15 = vmax.f32 %v596_v14, 0.0 }
 0x1af   : > { %v553_v16 = vpop.f32.mrf.mxu1 }
 0x1b0   : > { %679 = vst [vmem:[%s1374_s28 + $0xb0] sm:$0xff] %v647_v15  ;;  %v554_v17 = vadd.f32 %v1369_v33, %v553_v16 }
 0x1b2   : > { %v633_v18 = vmax.f32 %v554_v17, 0.0 }
 0x1b3   : > { %v598_v19 = vpop.f32.mrf.mxu3 }
 0x1b4   : > { %v599_v20 = vadd.f32 %v1369_v33, %v598_v19  ;;  %665 = vst [vmem:[%s1374_s28 + $0x40] sm:$0xff] %v633_v18 }
 0x1b6   : > { %v648_v21 = vmax.f32 %v599_v20, 0.0 }
 0x1b7   : > { %v556_v22 = vpop.f32.mrf.mxu1 }
 0x1b8   : > { %680 = vst [vmem:[%s1374_s28 + $0xb8] sm:$0xff] %v648_v21  ;;  %v557_v23 = vadd.f32 %v1369_v33, %v556_v22 }
 0x1ba   : > { %v634_v24 = vmax.f32 %v557_v23, 0.0 }
 0x1bb   : > { %v601_v25 = vpop.f32.mrf.mxu3 }
 0x1bc   : > { %v602_v26 = vadd.f32 %v1369_v33, %v601_v25  ;;  %666 = vst [vmem:[%s1374_s28 + $0x48] sm:$0xff] %v634_v24 }
 0x1be   : > { %v649_v27 = vmax.f32 %v602_v26, 0.0 }
 0x1bf   : > { %v559_v28 = vpop.f32.mrf.mxu1 }
 0x1c0   : > { %681 = vst [vmem:[%s1374_s28 + $0xc0] sm:$0xff] %v649_v27  ;;  %v560_v29 = vadd.f32 %v1369_v33, %v559_v28 }
 0x1c2   : > { %v635_v30 = vmax.f32 %v560_v29, 0.0 }
 0x1c3   : > { %v604_v31 = vpop.f32.mrf.mxu3 }
 0x1c4   : > { %v605_v32 = vadd.f32 %v1369_v33, %v604_v31  ;;  %667 = vst [vmem:[%s1374_s28 + $0x50] sm:$0xff] %v635_v30 }
 0x1c6   : > { %v650_v34 = vmax.f32 %v605_v32, 0.0 }
 0x1c7   : > { %v562_v35 = vpop.f32.mrf.mxu1 }
 0x1c8   : > { %682 = vst [vmem:[%s1374_s28 + $0xc8] sm:$0xff] %v650_v34  ;;  %v563_v36 = vadd.f32 %v1369_v33, %v562_v35 }
 0x1ca   : > { %v636_v37 = vmax.f32 %v563_v36, 0.0 }
 0x1cb   : > { %v607_v0 = vpop.f32.mrf.mxu3 }
 0x1cc   : > { %v608_v38 = vadd.f32 %v1369_v33, %v607_v0  ;;  %668 = vst [vmem:[%s1374_s28 + $0x58] sm:$0xff] %v636_v37 }
 0x1ce   : > { %v651_v39 = vmax.f32 %v608_v38, 0.0 }
 0x1cf   : > { %v565_v40 = vpop.f32.mrf.mxu1 }
 0x1d0   : > { %683 = vst [vmem:[%s1374_s28 + $0xd0] sm:$0xff] %v651_v39  ;;  %v566_v41 = vadd.f32 %v1369_v33, %v565_v40 }
 0x1d2   : > { %v637_v42 = vmax.f32 %v566_v41, 0.0 }
 0x1d3   : > { %v610_v43 = vpop.f32.mrf.mxu3 }
 0x1d4   : > { %v611_v44 = vadd.f32 %v1369_v33, %v610_v43  ;;  %669 = vst [vmem:[%s1374_s28 + $0x60] sm:$0xff] %v637_v42 }
 0x1d6   : > { %v652_v45 = vmax.f32 %v611_v44, 0.0 }
 0x1d7   : > { %v568_v46 = vpop.f32.mrf.mxu1 }
 0x1d8   : > { %684 = vst [vmem:[%s1374_s28 + $0xd8] sm:$0xff] %v652_v45  ;;  %v569_v47 = vadd.f32 %v1369_v33, %v568_v46 }
 0x1da   : > { %v638_v48 = vmax.f32 %v569_v47, 0.0 }
 0x1db   : > { %v613_v49 = vpop.f32.mrf.mxu3 }
 0x1dc   : > { %v614_v50 = vadd.f32 %v1369_v33, %v613_v49  ;;  %670 = vst [vmem:[%s1374_s28 + $0x68] sm:$0xff] %v638_v48 }
 0x1de   : > { %v653_v51 = vmax.f32 %v614_v50, 0.0 }
 0x1df   : > { %v571_v52 = vpop.f32.mrf.mxu1 }
 0x1e0   : > { %685 = vst [vmem:[%s1374_s28 + $0xe0] sm:$0xff] %v653_v51  ;;  %v572_v53 = vadd.f32 %v1369_v33, %v571_v52 }
 0x1e2   : > { %v639_v54 = vmax.f32 %v572_v53, 0.0 }
 0x1e3   : > { %v616_v55 = vpop.f32.mrf.mxu3 }
 0x1e4   : > { %v617_v56 = vadd.f32 %v1369_v33, %v616_v55  ;;  %671 = vst [vmem:[%s1374_s28 + $0x70] sm:$0xff] %v639_v54 }
 0x1e6   : > { %v654_v57 = vmax.f32 %v617_v56, 0.0 }
 0x1e7   : > { %v574_v58 = vpop.f32.mrf.mxu1 }
 0x1e8   : > { %686 = vst [vmem:[%s1374_s28 + $0xe8] sm:$0xff] %v654_v57  ;;  %v575_v59 = vadd.f32 %v1369_v33, %v574_v58 }
 0x1ea   : > { %v640_v60 = vmax.f32 %v575_v59, 0.0 }
 0x1eb   : > { %v619_v61 = vpop.f32.mrf.mxu3 }
 0x1ec   : > { %v620_v62 = vadd.f32 %v1369_v33, %v619_v61  ;;  %672 = vst [vmem:[%s1374_s28 + $0x78] sm:$0xff] %v640_v60 }
 0x1ee   : > { %v655_v63 = vmax.f32 %v620_v62, 0.0 }
 0x1f0   : > { %687 = vst [vmem:[%s1374_s28 + $0xf0] sm:$0xff] %v655_v63 }
 0x1f3   : > { %v622_v1 = vpop.f32.mrf.mxu3 }
 0x1f4   : > { %v623_v2 = vadd.f32 %v1369_v33, %v622_v1  ;;  %696 = sbr.rel (!%p1206_p11) target bundleno = 536 (0x218), region = 56 }
 0x1f6   : > { %v656_v3 = vmax.f32 %v623_v2, 0.0 }
 0x1f8   : > { %688 = vst [vmem:[%s1374_s28 + $0xf8] sm:$0xff] %v656_v3 }
 0x1f9   : > { %s1532_s25 = smov (!%p699_p6, %s698_s25), 32 }
 0x1fa   : > { %s823_s17 = sshll.u32 %s1532_s25, 3 }
 0x1fb   : > { %s702_s16 = ssub.s32 256, %s823_s17 }
 0x1fc   : > { %s703_s12 = sshll.u32 %s702_s16, 4 }
 0x1fd   : > { %704 = vsyncadd %s690_s8, %s703_s12  ;;  %p1448_p13 = scmp.ne.s32.totalorder %s823_s17, 0  ;;  %s831_s13 = sshll.u32 %s1175_s22, 8 }
 0x1fe   : > { %s707_s10 = scalar_lea.hbm %s1507_s5, %s831_s13  ;;  %s709_s23 = sshll.u32 %s1374_s28, 4  ;;  %s1457_s23 = int_to_ptr.vmem [resolvable:$true] %s709_s23 }
 0x1ff   : > { %s711_s29 = sshll.u32 %s707_s10, 4  ;;  %s827_s7 = sshll.u32 %s1532_s25, 7  ;;  %s1459_s29 = int_to_ptr.hbm [resolvable:$true] %s711_s29 }
 0x200   : > { %s1031_s11 = sshra.s32 %s1457_s23, 4  ;;  %s1033_s14 = sshrl.u32 %s827_s7, 4  ;;  %s1032_s11 = int_to_ptr.vmem [resolvable:$true] %s1031_s11 }
 0x201   : > { %s1038_s26 = scalar_lea.vmem %s1032_s11, %s1033_s14  ;;  %s1121_s22 = smov [#allocation8]  }
 0x202   : > { %p1039_p11 = scmp.ne.s32.totalorder %s1032_s11, %s1038_s26  ;;  %s1042_s17 = scalar_lea.vmem %s1121_s22, 512 }
 0x203   : > { %p1044_p9 = scmp.lt.s32.totalorder %s1042_s17, %s1038_s26 }
 0x204   : > { %p1040_p2 = pnand %p1039_p11, %p1448_p13 }
 0x206   : > { %p1041_p5 = pneg %p1040_p2 }
 0x208   : > { %p1046_p10 = pnand %p1044_p9, %p1041_p5 }
 0x20a   : > { %1049 = shalt.err (!%p1046_p10)
}
 0x20b   : > { %s1050_s28 = sshra.s32 %s1459_s29, 4  ;;  %s1061_s15 = scalar_lea.hbm %s1507_s5, 504  ;;  %s1051_s28 = int_to_ptr.hbm [resolvable:$true] %s1050_s28 }
 0x20c   : > { %s1057_s16 = scalar_lea.hbm %s1051_s28, %s1033_s14  ;;  %p1062_p7 = scmp.lt.s32.totalorder %s1051_s28, %s1507_s5 }
 0x20d   : > { %p1058_p1 = scmp.ne.s32.totalorder %s1051_s28, %s1057_s16  ;;  %p1063_p8 = scmp.lt.s32.totalorder %s1061_s15, %s1057_s16 }
 0x20f   : > { %p1059_p0 = pnand %p1058_p1, %p1448_p13  ;;  %p1064_p4 = por %p1063_p8, %p1062_p7 }
 0x211   : > { %p1060_p3 = pneg %p1059_p0 }
 0x213   : > { %p1065_p12 = pnand %p1064_p4, %p1060_p3 }
 0x215   : > { %1068 = shalt.err (!%p1065_p12)
}
 0x216   : > { %s1122_s11 = smov 128   ;;  %s1123_s14 = smov 8  }
 0x217   : > { %717 = dma.vmem_to_hbm [thread:$0]  (%p1448_p13), %s1457_s23, %s827_s7, %s1459_s29, %s690_s8, %s1122_s11, %s1122_s11, %s1123_s14  }
 0x218 PF: > { %s726_s26 = sand.u32 1, %s1100_s18   ;;  %p1523_p6 = scmp.ne.s32.totalorder %s1515_s6, 0 }
 0x219   : > { %p1524_p11 = scmp.ge.s32.totalorder %s1112_s21, 2  ;;  %s727_s22 = scalar_lea.sflag [#allocation4], %s726_s26 }
 0x21b   : > { %p882_p2 = pnand %p1524_p11, %p1523_p6 }
 0x21d   : > { %p883_p5 = pneg %p882_p2 }
 0x21f   : > { %1095 = dma.done.wait (%p883_p5), %s727_s22, 4096  }
 0x220   : > { %1097 = vsyncadd (%p883_p5), %s727_s22, 4294963200  ;;  %p19_p9 = scmp.ge.s32.totalorder %s1179_s24, 4   ;;  %s1525_s18 = smov %s1104_s19 }
 0x221   : > { %s1526_s19 = smov %s1108_s20  ;;  %s1527_s20 = smov %s1191_s27 }
 0x222   : > { %s1528_s21 = smov %s1179_s24  ;;  %21 = sbr.rel (!%p19_p9) target bundleno = 8 (0x8), region = 93 }
 0x227   :  { %733 = vsyncpa [#allocation3], 1 }
 0x228   :  { %735 = vsyncpa [#allocation3 + $0x1], 1 }
 0x229   :  { %736 = vsyncpa [#allocation6], 1 }
 0x22a   :  { %737 = vsyncpa [#allocation4], 1 }
 0x22b   :  { %739 = vsyncpa [#allocation4 + $0x1], 1 }

</bundles_post_ra>
